<compile_context>
chip_gen: v7x
topology: tpu7x:2x2x1
jax: 0.10.0
libtpu: 0.0.40
codegen_flags: <defaults>
</compile_context>

<pallas_src>
import functools
import numpy as np
import jax
import jax.numpy as jnp
from jax import lax
from jax.experimental import pallas as pl
from jax.experimental.pallas import tpu as pltpu


def get_same_padding(kernel_size):
    assert isinstance(kernel_size, int) and kernel_size % 2 > 0
    return kernel_size // 2


def _vmem_capacity_bytes():
    try:
        info = pltpu.get_tpu_info()
        cap = getattr(info, "vmem_capacity_bytes", None)
        if cap:
            return int(cap)
    except Exception:
        pass
    return 64 * 1024 * 1024       # conservative default (v7x per-core VMEM)


def _mbconv_kernel(*refs, K, Wc, HWi, L, TF, Ho, Wo, sh, expand, use_sub,
                   nf_last, cdt):
    it = iter(refs)
    x_ref = next(it)                              # (1, Cin, L) or (1, F, L)
    if expand:
        w1_ref = next(it)                         # (1, TF, Cin)  BN scale folded
        b1_ref = next(it)                         # (1, TF, 1)
        mask_ref = next(it)                       # (1, L) {0,1} valid-position mask
    wd_ref = next(it)                             # (1, TF, K*K)  BN scale folded
    bd_ref = next(it)                             # (1, TF, 1)
    selw_ref = next(it) if use_sub else None      # (Wc, Wo) one-hot column subsample
    w2_ref = next(it)                             # (1, Cout, TF) BN scale folded
    b2_ref = next(it)                             # (Cout, 1)
    o_ref = next(it)                              # (1, Cout, OUT_L)
    ep_ref = next(it)                             # VMEM scratch (TF, LS)
    acc_ref = next(it)                            # VMEM scratch (Cout, OUT_L) f32

    f = pl.program_id(1)

    # ---- 1x1 expand conv (+ folded BN) + bias + ReLU6 ------------------------
    # One mask multiply zeroes the spatial-padding lanes (bias/ReLU6 would
    # otherwise make them nonzero); every depthwise tap is then mask-free.
    if expand:
        e = jnp.dot(w1_ref[0], x_ref[0], preferred_element_type=jnp.float32)
        e = jnp.clip(e + b1_ref[0], 0.0, 6.0) * mask_ref[...]
    else:
        e = x_ref[0].astype(jnp.float32)          # wrapper already zero-padded x
    ep_ref[:, :L] = e.astype(ep_ref.dtype)

    # ---- KxK depthwise conv via contiguous lane-shifted taps (no masks) ------
    wdk_all = wd_ref[0]                           # (TF, K*K), f32
    dacc = None
    for kh in range(K):
        for kw in range(K):
            kk = kh * K + kw
            tap = ep_ref[:, pl.ds(kh * Wc + kw, HWi)].astype(jnp.float32)
            wdk = lax.slice(wdk_all, (0, kk), (TF, kk + 1))     # (TF, 1)
            term = tap * wdk
            dacc = term if dacc is None else dacc + term
    d = jnp.clip(dacc + bd_ref[0], 0.0, 6.0)      # (TF, HWi)

    # ---- strided subsample: contiguous row slices + tiny one-hot matmul ------
    if use_sub:
        selw = selw_ref[...]
        parts = []
        for ho in range(Ho):
            row = lax.slice(d, (0, ho * sh * Wc), (TF, ho * sh * Wc + Wc))
            parts.append(jnp.dot(row.astype(cdt), selw,
                                 preferred_element_type=jnp.float32))
        d = jnp.concatenate(parts, axis=1)        # (TF, Ho*Wo)

    # ---- 1x1 projection conv (+ folded BN); accumulate over feature tiles ----
    contrib = jnp.dot(w2_ref[0], d.astype(cdt), preferred_element_type=jnp.float32)

    @pl.when(f == 0)
    def _():
        acc_ref[...] = contrib

    @pl.when(f > 0)
    def _():
        acc_ref[...] += contrib

    @pl.when(f == nf_last)
    def _():
        o_ref[0] = (acc_ref[...] + b2_ref[...]).astype(o_ref.dtype)


def mb_inverted_conv(x_nchw, params, *, kernel_size=3, stride=(1, 1),
                     expand_ratio=6, eps=1e-5, use_bf16=False,
                     max_feature_tile=None, out_dtype=None):
    N, Cin, H, W = map(int, x_nchw.shape)
    K = int(kernel_size)
    pad = get_same_padding(K)
    sh, sw = stride
    expand = expand_ratio != 1
    use_sub = (sh, sw) != (1, 1)

    w_dw, g2, be2, m2, v2 = params['dw']          # (F, 1, K, K), (F,)x4
    w_pw, g3, be3, m3, v3 = params['pw']          # (Cout, F, 1, 1), (Cout,)x4
    F = int(w_dw.shape[0])
    Cout = int(w_pw.shape[0])
    if expand:
        w_exp, g1, be1, m1, v1 = params['exp']    # (F, Cin, 1, 1), (F,)x4
        assert int(w_exp.shape[0]) == F
    else:
        assert F == Cin, "expand_ratio==1 requires feature_dim == in_channels"

    Hp, Wc = H + 2 * pad, W + 2 * pad
    L = Hp * Wc                                   # padded per-image lane count
    HWi = H * Wc                                  # interior (output) lane count
    Ho = (H + 2 * pad - K) // sh + 1
    Wo = (W + 2 * pad - K) // sw + 1
    OUT_L = (Ho * Wo) if use_sub else HWi
    LS = ((L + (K - 1) * (Wc + 1) + 127) // 128) * 128

    cdt = jnp.bfloat16 if use_bf16 else jnp.float32
    odt = out_dtype if out_dtype is not None else (jnp.bfloat16 if use_bf16 else jnp.float32)
    item = jnp.dtype(cdt).itemsize
    oitem = jnp.dtype(odt).itemsize

    # ---- fold eval-mode BatchNorm into conv weights (scale) + bias -----------
    sd = g2 / jnp.sqrt(v2 + eps); bd = be2 - m2 * sd
    s2 = g3 / jnp.sqrt(v3 + eps); b2 = be3 - m3 * s2
    if expand:
        s1 = g1 / jnp.sqrt(v1 + eps); b1 = be1 - m1 * s1

    # ---- feature-tile size: keep per-step VMEM inside the device budget ------
    cap = _vmem_capacity_bytes()

    def vmem_need(tf):
        xblk = (Cin if expand else F) * L * item
        wblk = tf * (K * K + 1) * 4 + Cout * tf * item + Cout * 4
        if expand:
            wblk += tf * Cin * item + tf * 4 + L * 4
        if use_sub:
            wblk += Wc * Wo * item
        dbuf = 2 * (xblk + wblk + Cout * OUT_L * oitem)     # double-buffered blocks
        scratch = tf * LS * item + Cout * OUT_L * 4
        values = 4 * tf * L * 4 + 2 * Cout * OUT_L * 4      # e / dacc / d / taps
        return dbuf + scratch + values

    if not expand:
        NF = 1
    else:
        NF = F
        for nf in range(1, F + 1):
            if F % nf:
                continue
            tf = F // nf
            if max_feature_tile is not None:
                if tf <= max_feature_tile:
                    NF = nf
                    break
            elif vmem_need(tf) <= int(0.40 * cap):
                NF = nf
                break
    TF = F // NF
    need = vmem_need(TF)
    vmem_limit = int(min(cap - (8 << 20),
                         max(int(need * 1.5) + (4 << 20), 32 << 20)))

    # ---- reshaped, BN-folded weights (layouts chosen so every block == full
    #      array on its last two dims -> no (8,128) blocking issues for any TF) -
    wd_r = (w_dw[:, 0].reshape(F, K * K) * sd[:, None]).astype(jnp.float32)
    wd_r = wd_r.reshape(NF, TF, K * K)
    bd_r = bd.reshape(NF, TF, 1).astype(jnp.float32)
    w2_r = (w_pw[:, :, 0, 0] * s2[:, None]).astype(cdt)                 # (Cout, F)
    w2_r = w2_r.reshape(Cout, NF, TF).transpose(1, 0, 2)                # (NF, Cout, TF)
    b2_r = b2[:, None].astype(jnp.float32)                              # (Cout, 1)
    if expand:
        w1_r = (w_exp[:, :, 0, 0] * s1[:, None]).astype(cdt).reshape(NF, TF, Cin)
        b1_r = b1.reshape(NF, TF, 1).astype(jnp.float32)
        mnp = np.zeros((Hp, Wc), np.float32)
        mnp[pad:pad + H, pad:pad + W] = 1.0
        mask = jnp.asarray(mnp.reshape(1, L))
    if use_sub:
        selnp = np.zeros((Wc, Wo), np.float32)
        for wo in range(Wo):
            selnp[wo * sw, wo] = 1.0
        selw = jnp.asarray(selnp).astype(cdt)

    # input: zero-padded NCHW with spatial dims flattened -> lane-dense (N,C,L)
    x_pad = jnp.pad(x_nchw, ((0, 0), (0, 0), (pad, pad), (pad, pad)))
    x_flat = x_pad.reshape(N, Cin, L).astype(cdt)

    kernel = functools.partial(_mbconv_kernel, K=K, Wc=Wc, HWi=HWi, L=L, TF=TF,
                               Ho=Ho, Wo=Wo, sh=sh, expand=expand,
                               use_sub=use_sub, nf_last=NF - 1, cdt=cdt)

    in_specs = [pl.BlockSpec((1, Cin, L), lambda n, f: (n, 0, 0))]
    operands = [x_flat]
    if expand:
        in_specs += [pl.BlockSpec((1, TF, Cin), lambda n, f: (f, 0, 0)),
                     pl.BlockSpec((1, TF, 1), lambda n, f: (f, 0, 0)),
                     pl.BlockSpec((1, L), lambda n, f: (0, 0))]
        operands += [w1_r, b1_r, mask]
    in_specs += [pl.BlockSpec((1, TF, K * K), lambda n, f: (f, 0, 0)),
                 pl.BlockSpec((1, TF, 1), lambda n, f: (f, 0, 0))]
    operands += [wd_r, bd_r]
    if use_sub:
        in_specs += [pl.BlockSpec((Wc, Wo), lambda n, f: (0, 0))]
        operands += [selw]
    in_specs += [pl.BlockSpec((1, Cout, TF), lambda n, f: (f, 0, 0)),
                 pl.BlockSpec((Cout, 1), lambda n, f: (0, 0))]
    operands += [w2_r, b2_r]

    flops = 2 * K * K * F * HWi + 2 * Cout * F * OUT_L
    if expand:
        flops += 2 * F * Cin * L
    if use_sub:
        flops += 2 * F * Ho * Wc * Wo
    bytes_acc = (int(x_flat.size) * item + N * Cout * OUT_L * oitem +
                 sum(int(np.prod(o.shape)) * o.dtype.itemsize for o in operands[1:]))
    cost = pl.CostEstimate(flops=int(N * flops), transcendentals=0,
                           bytes_accessed=int(bytes_acc))

    out_flat = pl.pallas_call(
        kernel,
        out_shape=jax.ShapeDtypeStruct((N, Cout, OUT_L), odt),
        grid=(N, NF),
        in_specs=in_specs,
        out_specs=pl.BlockSpec((1, Cout, OUT_L), lambda n, f: (n, 0, 0)),
        scratch_shapes=[pltpu.VMEM((TF, LS), cdt),
                        pltpu.VMEM((Cout, OUT_L), jnp.float32)],
        compiler_params=pltpu.CompilerParams(
            dimension_semantics=("parallel", "arbitrary"),
            vmem_limit_bytes=vmem_limit),
        cost_estimate=cost,
    )(*operands)

    if use_sub:
        return out_flat.reshape(N, Cout, Ho, Wo)
    # drop the column padding that rode along in the lane layout (free-ish slice)
    return out_flat.reshape(N, Cout, H, Wc)[:, :, :, :W]


# ---------- pure-JAX reference (mirrors the PyTorch forward, eval-mode BN) ----------
def reference(x, params, kernel_size, stride, expand_ratio, eps=1e-5):
    w_dw, g2, be2, m2, v2 = params['dw']
    w_pw, g3, be3, m3, v3 = params['pw']
    K = kernel_size
    pad = K // 2
    F = w_dw.shape[0]

    def bn(y, g, b, m, v):
        s = (1, -1, 1, 1)
        return (y - m.reshape(s)) / jnp.sqrt(v.reshape(s) + eps) * g.reshape(s) + b.reshape(s)

    y = x
    if expand_ratio != 1:
        w_exp, g1, be1, m1, v1 = params['exp']
        y = lax.conv_general_dilated(y, w_exp, (1, 1), 'VALID',
                                     dimension_numbers=('NCHW', 'OIHW', 'NCHW'))
        y = jnp.clip(bn(y, g1, be1, m1, v1), 0.0, 6.0)
    y = lax.conv_general_dilated(y, w_dw, stride, [(pad, pad), (pad, pad)],
                                 dimension_numbers=('NCHW', 'OIHW', 'NCHW'),
                                 feature_group_count=F)
    y = jnp.clip(bn(y, g2, be2, m2, v2), 0.0, 6.0)
    y = lax.conv_general_dilated(y, w_pw, (1, 1), 'VALID',
                                 dimension_numbers=('NCHW', 'OIHW', 'NCHW'))
    return bn(y, g3, be3, m3, v3)


def make_params(key, Cin, Cout, K, expand_ratio):
    F = round(Cin * expand_ratio)
    ks = jax.random.split(key, 15)

    def rand(k, shape, scale=0.1):
        return scale * jax.random.normal(k, shape, dtype=jnp.float32)

    def bnp(k0, k1, k2, k3, C):
        return (1.0 + rand(k0, (C,)), rand(k1, (C,)), rand(k2, (C,)),
                1.0 + 0.1 * jnp.abs(jax.random.normal(k3, (C,))))

    p = {'dw': (rand(ks[5], (F, 1, K, K)),) + bnp(ks[6], ks[7], ks[8], ks[9], F),
         'pw': (rand(ks[10], (Cout, F, 1, 1)),) + bnp(ks[11], ks[12], ks[13], ks[14], Cout)}
    if expand_ratio != 1:
        p['exp'] = (rand(ks[0], (F, Cin, 1, 1)),) + bnp(ks[1], ks[2], ks[3], ks[4], F)
    return p


if __name__ == "__main__":
    key = jax.random.PRNGKey(0)
    N, Cin, H, W = 2, 4, 16, 16
    Cout = 8

    k_p3, k_p5, k_p1, k_x = jax.random.split(key, 4)
    params3 = make_params(k_p3, Cin, Cout, 3, 6)          # 3x3 MBConv6
    params5 = make_params(k_p5, Cin, Cout, 5, 6)          # 5x5 MBConv6
    params1 = make_params(k_p1, Cin, Cout, 3, 1)          # 3x3 MBConv1 (no expand)
    x = jax.random.normal(k_x, (N, Cin, H, W), dtype=jnp.float32)

    # 1) 3x3 MBConv6, stride (1,1), f32
    out = jax.block_until_ready(
        mb_inverted_conv(x, params3, kernel_size=3, stride=(1, 1), expand_ratio=6))
    ref = reference(x, params3, 3, (1, 1), 6)
    assert out.shape == ref.shape == (N, Cout, H, W)
    np.testing.assert_allclose(np.asarray(out), np.asarray(ref), rtol=2e-4, atol=2e-4)

    # 2) 3x3 MBConv6, strided (2,2) -- no one-hot (HW x HoWo) matmul any more
    out_s = jax.block_until_ready(
        mb_inverted_conv(x, params3, kernel_size=3, stride=(2, 2), expand_ratio=6))
    ref_s = reference(x, params3, 3, (2, 2), 6)
    assert out_s.shape == ref_s.shape == (N, Cout, 8, 8)
    np.testing.assert_allclose(np.asarray(out_s), np.asarray(ref_s), rtol=2e-4, atol=2e-4)

    # 3) feature-dim tiled path (2nd grid axis accumulates over F tiles)
    out_t = jax.block_until_ready(
        mb_inverted_conv(x, params3, kernel_size=3, stride=(1, 1), expand_ratio=6,
                         max_feature_tile=8))
    np.testing.assert_allclose(np.asarray(out_t), np.asarray(ref), rtol=2e-4, atol=2e-4)

    # 4) bf16 storage / MXU / output path (f32 accumulation), looser tolerance
    out_b = jax.block_until_ready(
        mb_inverted_conv(x, params3, kernel_size=3, stride=(1, 1), expand_ratio=6,
                         use_bf16=True))
    np.testing.assert_allclose(np.asarray(out_b).astype(np.float32), np.asarray(ref),
                               rtol=3e-2, atol=3e-2)

    # 5) 5x5 MBConv6 with AutoSTR-style asymmetric stride (2,1)
    out_5 = jax.block_until_ready(
        mb_inverted_conv(x, params5, kernel_size=5, stride=(2, 1), expand_ratio=6))
    ref_5 = reference(x, params5, 5, (2, 1), 6)
    assert out_5.shape == ref_5.shape == (N, Cout, 8, 16)
    np.testing.assert_allclose(np.asarray(out_5), np.asarray(ref_5), rtol=2e-4, atol=2e-4)

    # 6) MBConv1 (expand_ratio == 1, no inverted bottleneck)
    out_1 = jax.block_until_ready(
        mb_inverted_conv(x, params1, kernel_size=3, stride=(1, 1), expand_ratio=1))
    ref_1 = reference(x, params1, 3, (1, 1), 1)
    assert out_1.shape == ref_1.shape == (N, Cout, H, W)
    np.testing.assert_allclose(np.asarray(out_1), np.asarray(ref_1), rtol=2e-4, atol=2e-4)

    print("KERNEL_OK")
</pallas_src>

<mosaic_0001>
module attributes {stable_mosaic.version = 11 : i64} {
  func.func @_mbconv_kernel(%arg0: i32, %arg1: i32, %arg2: memref<1x4x324xf32, #tpu.memory_space<vmem>>, %arg3: memref<1x24x4xf32, #tpu.memory_space<vmem>>, %arg4: memref<1x24x1xf32, #tpu.memory_space<vmem>>, %arg5: memref<1x324xf32, #tpu.memory_space<vmem>>, %arg6: memref<1x24x9xf32, #tpu.memory_space<vmem>>, %arg7: memref<1x24x1xf32, #tpu.memory_space<vmem>>, %arg8: memref<1x8x24xf32, #tpu.memory_space<vmem>>, %arg9: memref<8x1xf32, #tpu.memory_space<vmem>>, %arg10: memref<1x8x288xf32, #tpu.memory_space<vmem>>, %arg11: memref<24x384xf32, #tpu.memory_space<vmem>>, %arg12: memref<8x288xf32, #tpu.memory_space<vmem>>) attributes {dimension_semantics = [#tpu.dimension_semantics<parallel>, #tpu.dimension_semantics<arbitrary>], iteration_bounds = array<i64: 2, 1>, scalar_prefetch = 0 : i64, scratch_operands = 2 : i64, tpu.core_type = #tpu.core_type<tc>, window_params = [{transform_indices = @transform_0, window_bounds = array<i64: 1, 4, 324>}, {transform_indices = @transform_1, window_bounds = array<i64: 1, 24, 4>}, {transform_indices = @transform_2, window_bounds = array<i64: 1, 24, 1>}, {pipeline_mode = #tpu.pipeline_mode<synchronous>, transform_indices = @transform_3, window_bounds = array<i64: 1, 324>}, {transform_indices = @transform_4, window_bounds = array<i64: 1, 24, 9>}, {transform_indices = @transform_5, window_bounds = array<i64: 1, 24, 1>}, {transform_indices = @transform_6, window_bounds = array<i64: 1, 8, 24>}, {pipeline_mode = #tpu.pipeline_mode<synchronous>, transform_indices = @transform_7, window_bounds = array<i64: 8, 1>}, {transform_indices = @transform_8, window_bounds = array<i64: 1, 8, 288>}]} {
    %c0 = arith.constant 0 : index
    %c0_0 = arith.constant 0 : index
    %c0_1 = arith.constant 0 : index
    %0 = vector.load %arg3[%c0, %c0_0, %c0_1] : memref<1x24x4xf32, #tpu.memory_space<vmem>>, vector<1x24x4xf32>
    %1 = vector.shape_cast %0 : vector<1x24x4xf32> to vector<24x4xf32>
    %c0_2 = arith.constant 0 : index
    %c0_3 = arith.constant 0 : index
    %c0_4 = arith.constant 0 : index
    %2 = vector.load %arg2[%c0_2, %c0_3, %c0_4] : memref<1x4x324xf32, #tpu.memory_space<vmem>>, vector<1x4x324xf32>
    %3 = vector.shape_cast %2 : vector<1x4x324xf32> to vector<4x324xf32>
    %cst = arith.constant dense<0.000000e+00> : vector<24x324xf32>
    %4 = tpu.matmul %1, %3, %cst {dimension_numbers = #tpu.dot_dimension_numbers<[1], [0], [0], [1], [0, 0, 1, 1], [], []>} : vector<24x4xf32>, vector<4x324xf32>, vector<24x324xf32> -> vector<24x324xf32>
    %c0_5 = arith.constant 0 : index
    %c0_6 = arith.constant 0 : index
    %c0_7 = arith.constant 0 : index
    %5 = vector.load %arg4[%c0_5, %c0_6, %c0_7] : memref<1x24x1xf32, #tpu.memory_space<vmem>>, vector<1x24x1xf32>
    %6 = vector.shape_cast %5 : vector<1x24x1xf32> to vector<24x1xf32>
    %7 = vector.broadcast %6 : vector<24x1xf32> to vector<24x324xf32>
    %8 = arith.addf %4, %7 : vector<24x324xf32>
    %cst_8 = arith.constant 0.000000e+00 : f32
    %cst_9 = arith.constant 6.000000e+00 : f32
    %9 = vector.broadcast %cst_8 : f32 to vector<24x324xf32>
    %10 = arith.maximumf %9, %8 : vector<24x324xf32>
    %11 = vector.broadcast %cst_9 : f32 to vector<24x324xf32>
    %12 = arith.minimumf %11, %10 : vector<24x324xf32>
    %c0_10 = arith.constant 0 : index
    %c0_11 = arith.constant 0 : index
    %13 = vector.load %arg5[%c0_10, %c0_11] : memref<1x324xf32, #tpu.memory_space<vmem>>, vector<1x324xf32>
    %14 = vector.broadcast %13 : vector<1x324xf32> to vector<24x324xf32>
    %15 = arith.mulf %12, %14 : vector<24x324xf32>
    %c0_12 = arith.constant 0 : index
    %c0_13 = arith.constant 0 : index
    %16 = vector.load %arg11[%c0_12, %c0_13] : memref<24x384xf32, #tpu.memory_space<vmem>>, vector<24x324xf32>
    tpu.vector_store %arg11[%c0_12, %c0_13], %15 {strides = array<i32>} : memref<24x384xf32, #tpu.memory_space<vmem>>, vector<24x324xf32>,
    %c0_14 = arith.constant 0 : index
    %c0_15 = arith.constant 0 : index
    %c0_16 = arith.constant 0 : index
    %17 = vector.load %arg6[%c0_14, %c0_15, %c0_16] : memref<1x24x9xf32, #tpu.memory_space<vmem>>, vector<1x24x9xf32>
    %18 = vector.shape_cast %17 : vector<1x24x9xf32> to vector<24x9xf32>
    %c0_17 = arith.constant 0 : index
    %c0_18 = arith.constant 0 : index
    %19 = vector.load %arg11[%c0_17, %c0_18] : memref<24x384xf32, #tpu.memory_space<vmem>>, vector<24x288xf32>
    %20 = vector.extract_strided_slice %18 {offsets = [0, 0], sizes = [24, 1], strides = [1, 1]} : vector<24x9xf32> to vector<24x1xf32>
    %21 = vector.broadcast %20 : vector<24x1xf32> to vector<24x288xf32>
    %22 = arith.mulf %19, %21 : vector<24x288xf32>
    %c0_19 = arith.constant 0 : index
    %c1 = arith.constant 1 : index
    %23 = vector.load %arg11[%c0_19, %c1] : memref<24x384xf32, #tpu.memory_space<vmem>>, vector<24x288xf32>
    %24 = vector.extract_strided_slice %18 {offsets = [0, 1], sizes = [24, 1], strides = [1, 1]} : vector<24x9xf32> to vector<24x1xf32>
    %25 = vector.broadcast %24 : vector<24x1xf32> to vector<24x288xf32>
    %26 = arith.mulf %23, %25 : vector<24x288xf32>
    %27 = arith.addf %22, %26 : vector<24x288xf32>
    %c0_20 = arith.constant 0 : index
    %c2 = arith.constant 2 : index
    %28 = vector.load %arg11[%c0_20, %c2] : memref<24x384xf32, #tpu.memory_space<vmem>>, vector<24x288xf32>
    %29 = vector.extract_strided_slice %18 {offsets = [0, 2], sizes = [24, 1], strides = [1, 1]} : vector<24x9xf32> to vector<24x1xf32>
    %30 = vector.broadcast %29 : vector<24x1xf32> to vector<24x288xf32>
    %31 = arith.mulf %28, %30 : vector<24x288xf32>
    %32 = arith.addf %27, %31 : vector<24x288xf32>
    %c0_21 = arith.constant 0 : index
    %c18 = arith.constant 18 : index
    %33 = vector.load %arg11[%c0_21, %c18] : memref<24x384xf32, #tpu.memory_space<vmem>>, vector<24x288xf32>
    %34 = vector.extract_strided_slice %18 {offsets = [0, 3], sizes = [24, 1], strides = [1, 1]} : vector<24x9xf32> to vector<24x1xf32>
    %35 = vector.broadcast %34 : vector<24x1xf32> to vector<24x288xf32>
    %36 = arith.mulf %33, %35 : vector<24x288xf32>
    %37 = arith.addf %32, %36 : vector<24x288xf32>
    %c0_22 = arith.constant 0 : index
    %c19 = arith.constant 19 : index
    %38 = vector.load %arg11[%c0_22, %c19] : memref<24x384xf32, #tpu.memory_space<vmem>>, vector<24x288xf32>
    %39 = vector.extract_strided_slice %18 {offsets = [0, 4], sizes = [24, 1], strides = [1, 1]} : vector<24x9xf32> to vector<24x1xf32>
    %40 = vector.broadcast %39 : vector<24x1xf32> to vector<24x288xf32>
    %41 = arith.mulf %38, %40 : vector<24x288xf32>
    %42 = arith.addf %37, %41 : vector<24x288xf32>
    %c0_23 = arith.constant 0 : index
    %c20 = arith.constant 20 : index
    %43 = vector.load %arg11[%c0_23, %c20] : memref<24x384xf32, #tpu.memory_space<vmem>>, vector<24x288xf32>
    %44 = vector.extract_strided_slice %18 {offsets = [0, 5], sizes = [24, 1], strides = [1, 1]} : vector<24x9xf32> to vector<24x1xf32>
    %45 = vector.broadcast %44 : vector<24x1xf32> to vector<24x288xf32>
    %46 = arith.mulf %43, %45 : vector<24x288xf32>
    %47 = arith.addf %42, %46 : vector<24x288xf32>
    %c0_24 = arith.constant 0 : index
    %c36 = arith.constant 36 : index
    %48 = vector.load %arg11[%c0_24, %c36] : memref<24x384xf32, #tpu.memory_space<vmem>>, vector<24x288xf32>
    %49 = vector.extract_strided_slice %18 {offsets = [0, 6], sizes = [24, 1], strides = [1, 1]} : vector<24x9xf32> to vector<24x1xf32>
    %50 = vector.broadcast %49 : vector<24x1xf32> to vector<24x288xf32>
    %51 = arith.mulf %48, %50 : vector<24x288xf32>
    %52 = arith.addf %47, %51 : vector<24x288xf32>
    %c0_25 = arith.constant 0 : index
    %c37 = arith.constant 37 : index
    %53 = vector.load %arg11[%c0_25, %c37] : memref<24x384xf32, #tpu.memory_space<vmem>>, vector<24x288xf32>
    %54 = vector.extract_strided_slice %18 {offsets = [0, 7], sizes = [24, 1], strides = [1, 1]} : vector<24x9xf32> to vector<24x1xf32>
    %55 = vector.broadcast %54 : vector<24x1xf32> to vector<24x288xf32>
    %56 = arith.mulf %53, %55 : vector<24x288xf32>
    %57 = arith.addf %52, %56 : vector<24x288xf32>
    %c0_26 = arith.constant 0 : index
    %c38 = arith.constant 38 : index
    %58 = vector.load %arg11[%c0_26, %c38] : memref<24x384xf32, #tpu.memory_space<vmem>>, vector<24x288xf32>
    %59 = vector.extract_strided_slice %18 {offsets = [0, 8], sizes = [24, 1], strides = [1, 1]} : vector<24x9xf32> to vector<24x1xf32>
    %60 = vector.broadcast %59 : vector<24x1xf32> to vector<24x288xf32>
    %61 = arith.mulf %58, %60 : vector<24x288xf32>
    %62 = arith.addf %57, %61 : vector<24x288xf32>
    %c0_27 = arith.constant 0 : index
    %c0_28 = arith.constant 0 : index
    %c0_29 = arith.constant 0 : index
    %63 = vector.load %arg7[%c0_27, %c0_28, %c0_29] : memref<1x24x1xf32, #tpu.memory_space<vmem>>, vector<1x24x1xf32>
    %64 = vector.shape_cast %63 : vector<1x24x1xf32> to vector<24x1xf32>
    %65 = vector.broadcast %64 : vector<24x1xf32> to vector<24x288xf32>
    %66 = arith.addf %62, %65 : vector<24x288xf32>
    %cst_30 = arith.constant 0.000000e+00 : f32
    %cst_31 = arith.constant 6.000000e+00 : f32
    %67 = vector.broadcast %cst_30 : f32 to vector<24x288xf32>
    %68 = arith.maximumf %67, %66 : vector<24x288xf32>
    %69 = vector.broadcast %cst_31 : f32 to vector<24x288xf32>
    %70 = arith.minimumf %69, %68 : vector<24x288xf32>
    %c0_32 = arith.constant 0 : index
    %c0_33 = arith.constant 0 : index
    %c0_34 = arith.constant 0 : index
    %71 = vector.load %arg8[%c0_32, %c0_33, %c0_34] : memref<1x8x24xf32, #tpu.memory_space<vmem>>, vector<1x8x24xf32>
    %72 = vector.shape_cast %71 : vector<1x8x24xf32> to vector<8x24xf32>
    %cst_35 = arith.constant dense<0.000000e+00> : vector<8x288xf32>
    %73 = tpu.matmul %72, %70, %cst_35 {dimension_numbers = #tpu.dot_dimension_numbers<[1], [0], [0], [1], [0, 0, 1, 1], [], []>} : vector<8x24xf32>, vector<24x288xf32>, vector<8x288xf32> -> vector<8x288xf32>
    %c0_i32 = arith.constant 0 : i32
    %74 = arith.cmpi eq, %arg1, %c0_i32 : i32
    %75 = arith.extui %74 : i1 to i32
    %c0_i32_36 = arith.constant 0 : i32
    %76 = arith.cmpi ne, %75, %c0_i32_36 : i32
    scf.if %76 {
      %c0_41 = arith.constant 0 : index
      %c0_42 = arith.constant 0 : index
      %83 = vector.load %arg12[%c0_41, %c0_42] : memref<8x288xf32, #tpu.memory_space<vmem>>, vector<8x288xf32>
      tpu.vector_store %arg12[%c0_41, %c0_42], %73 {strides = array<i32>} : memref<8x288xf32, #tpu.memory_space<vmem>>, vector<8x288xf32>,
    } else {
    }
    %c0_i32_37 = arith.constant 0 : i32
    %77 = arith.cmpi sgt, %arg1, %c0_i32_37 : i32
    %78 = arith.extui %77 : i1 to i32
    %c0_i32_38 = arith.constant 0 : i32
    %79 = arith.cmpi ne, %78, %c0_i32_38 : i32
    scf.if %79 {
      %c0_41 = arith.constant 0 : index
      %c0_42 = arith.constant 0 : index
      %83 = vector.load %arg12[%c0_41, %c0_42] : memref<8x288xf32, #tpu.memory_space<vmem>>, vector<8x288xf32>
      %84 = arith.addf %83, %73 : vector<8x288xf32>
      %c0_43 = arith.constant 0 : index
      %c0_44 = arith.constant 0 : index
      %85 = vector.load %arg12[%c0_43, %c0_44] : memref<8x288xf32, #tpu.memory_space<vmem>>, vector<8x288xf32>
      tpu.vector_store %arg12[%c0_43, %c0_44], %84 {strides = array<i32>} : memref<8x288xf32, #tpu.memory_space<vmem>>, vector<8x288xf32>,
    } else {
    }
    %c0_i32_39 = arith.constant 0 : i32
    %80 = arith.cmpi eq, %arg1, %c0_i32_39 : i32
    %81 = arith.extui %80 : i1 to i32
    %c0_i32_40 = arith.constant 0 : i32
    %82 = arith.cmpi ne, %81, %c0_i32_40 : i32
    scf.if %82 {
      %c0_41 = arith.constant 0 : index
      %c0_42 = arith.constant 0 : index
      %83 = vector.load %arg12[%c0_41, %c0_42] : memref<8x288xf32, #tpu.memory_space<vmem>>, vector<8x288xf32>
      %c0_43 = arith.constant 0 : index
      %c0_44 = arith.constant 0 : index
      %84 = vector.load %arg9[%c0_43, %c0_44] : memref<8x1xf32, #tpu.memory_space<vmem>>, vector<8x1xf32>
      %85 = vector.broadcast %84 : vector<8x1xf32> to vector<8x288xf32>
      %86 = arith.addf %83, %85 : vector<8x288xf32>
      %c0_45 = arith.constant 0 : index
      %c0_46 = arith.constant 0 : index
      %c0_47 = arith.constant 0 : index
      %87 = vector.load %arg10[%c0_45, %c0_46, %c0_47] : memref<1x8x288xf32, #tpu.memory_space<vmem>>, vector<1x8x288xf32>
      %88 = vector.shape_cast %87 : vector<1x8x288xf32> to vector<8x288xf32>
      %89 = vector.shape_cast %86 : vector<8x288xf32> to vector<1x8x288xf32>
      tpu.vector_store %arg10[%c0_45, %c0_46, %c0_47], %89 {strides = array<i32>} : memref<1x8x288xf32, #tpu.memory_space<vmem>>, vector<1x8x288xf32>,
    } else {
    }
    return
  }
  func.func @transform_0(%arg0: i32, %arg1: i32) -> (i32, i32, i32) {
    %c0_i32 = arith.constant 0 : i32
    %c0_i32_0 = arith.constant 0 : i32
    %c0_i32_1 = arith.constant 0 : i32
    return %arg0, %c0_i32, %c0_i32_0 : i32, i32, i32
  }
  func.func @transform_1(%arg0: i32, %arg1: i32) -> (i32, i32, i32) {
    %c0_i32 = arith.constant 0 : i32
    %c0_i32_0 = arith.constant 0 : i32
    %c0_i32_1 = arith.constant 0 : i32
    return %arg1, %c0_i32, %c0_i32_0 : i32, i32, i32
  }
  func.func @transform_2(%arg0: i32, %arg1: i32) -> (i32, i32, i32) {
    %c0_i32 = arith.constant 0 : i32
    %c0_i32_0 = arith.constant 0 : i32
    %c0_i32_1 = arith.constant 0 : i32
    return %arg1, %c0_i32, %c0_i32_0 : i32, i32, i32
  }
  func.func @transform_3(%arg0: i32, %arg1: i32) -> (i32, i32) {
    %c0_i32 = arith.constant 0 : i32
    %c0_i32_0 = arith.constant 0 : i32
    %c0_i32_1 = arith.constant 0 : i32
    return %c0_i32, %c0_i32_0 : i32, i32
  }
  func.func @transform_4(%arg0: i32, %arg1: i32) -> (i32, i32, i32) {
    %c0_i32 = arith.constant 0 : i32
    %c0_i32_0 = arith.constant 0 : i32
    %c0_i32_1 = arith.constant 0 : i32
    return %arg1, %c0_i32, %c0_i32_0 : i32, i32, i32
  }
  func.func @transform_5(%arg0: i32, %arg1: i32) -> (i32, i32, i32) {
    %c0_i32 = arith.constant 0 : i32
    %c0_i32_0 = arith.constant 0 : i32
    %c0_i32_1 = arith.constant 0 : i32
    return %arg1, %c0_i32, %c0_i32_0 : i32, i32, i32
  }
  func.func @transform_6(%arg0: i32, %arg1: i32) -> (i32, i32, i32) {
    %c0_i32 = arith.constant 0 : i32
    %c0_i32_0 = arith.constant 0 : i32
    %c0_i32_1 = arith.constant 0 : i32
    return %arg1, %c0_i32, %c0_i32_0 : i32, i32, i32
  }
  func.func @transform_7(%arg0: i32, %arg1: i32) -> (i32, i32) {
    %c0_i32 = arith.constant 0 : i32
    %c0_i32_0 = arith.constant 0 : i32
    %c0_i32_1 = arith.constant 0 : i32
    return %c0_i32, %c0_i32_0 : i32, i32
  }
  func.func @transform_8(%arg0: i32, %arg1: i32) -> (i32, i32, i32) {
    %c0_i32 = arith.constant 0 : i32
    %c0_i32_0 = arith.constant 0 : i32
    %c0_i32_1 = arith.constant 0 : i32
    return %arg0, %c0_i32, %c0_i32_0 : i32, i32, i32
  }
}

</mosaic_0001>

<bundles_post_ra>
// kernel: tpu_custom_call.1
= control target key start
LH: loop header
LB: loop body
LE: loop exit
PB: predicated region body
PF: predicated region fallthrough
CT: control target
= control target key end

     0   :  { %13 = vsyncpa [#allocation5], 0  ;;  %s2665_s0 = inlined_call_operand.vmem [shape: f32[2,4,324], index: 0, kind: input, shape index: {}]   ;;  %s2666_s1 = inlined_call_operand.vmem [shape: f32[1,24,4], index: 1, kind: input, shape index: {}]   ;;  %s2667_s2 = inlined_call_operand.vmem [shape: f32[1,24,1], index: 2, kind: input, shape index: {}]   ;;  %s2668_s3 = inlined_call_operand.vmem [shape: f32[1,324], index: 3, kind: input, shape index: {}]   ;;  %s2669_s4 = inlined_call_operand.vmem [shape: f32[1,24,9], index: 4, kind: input, shape index: {}]   ;;  %s2670_s5 = inlined_call_operand.vmem [shape: f32[1,24,1], index: 5, kind: input, shape index: {}]   ;;  %s2671_s6 = inlined_call_operand.vmem [shape: f32[1,8,24], index: 6, kind: input, shape index: {}]   ;;  %s2672_s7 = inlined_call_operand.vmem [shape: f32[8,1], index: 7, kind: input, shape index: {}]   ;;  %s2673_s8 = inlined_call_operand.hbm [shape: f32[2,8,288], index: 8, kind: output, shape index: {}]  }
   0x1   :  { %15 = vsyncpa [#allocation5 + $0x1], 0  ;;  %s1992_s27 = smov 0   ;;  %s1994_s28 = smov 0  }
   0x2   :  { %s1996_s29 = smov 0   ;;  %s1998_s30 = smov 0  }
   0x3   :  { %s2000_s9 = smov 0   ;;  %s2002_s10 = smov 0  }
   0x4 LB: > { %s1682_s11 = sadd.s32 4294967295, %s1924_s10   ;;  %s1683_s12 = sadd.s32 4294967294, %s1924_s10   ;;  %s1924_s10 = sphi %s2002_s10, %s21_s10   ;;  %s1920_s9 = sphi %s2000_s9, %s2680_s9   ;;  %s1916_s30 = sphi %s1998_s30, %s2679_s30   ;;  %s1912_s29 = sphi %s1996_s29, %s2678_s29   ;;  %s1908_s28 = sphi %s1994_s28, %s2677_s28   ;;  %s1904_s27 = sphi %s1992_s27, %s2676_s27  }
   0x5   : > { %s33_s13 = sadd.s32 1, %s1920_s9  ;;  %s238_s14 = sadd.s32 1, %s1912_s29 }
   0x6   : > { %p35_p0 = scmp.ge.s32.totalorder %s33_s13, 2  ;;  %p248_p1 = scmp.ne.s32.totalorder %s1912_s29, %s1908_s28 }
   0x7   : > { %p249_p2 = scmp.eq.s32.totalorder %s1682_s11, 1  ;;  %p254_p3 = scmp.ne.s32.totalorder %s1908_s28, %s1904_s27 }
   0x8   : > { %s2682_s13 = smov (%p35_p0, %s33_s13), 0  ;;  %p255_p5 = scmp.eq.s32.totalorder %s1683_s12, 1 }
   0x9   : > { %p2032_p4 = por %p249_p2, %p248_p1  ;;  %s235_s16 = ssub.s32 %s1920_s9, %s2682_s13 }
   0xa   : > { %p1691_p6 = scmp.ge.s32.totalorder %s1924_s10, 1  ;;  %p236_p7 = scmp.eq.s32.totalorder %s235_s16, 0 }
   0xb   : > { %p2039_p8 = por %p255_p5, %p254_p3  ;;  %p326_p9 = scmp.lt.s32.totalorder %s1924_s10, 3 }
   0xc   : > { %s2045_s18 = scalar_select %p236_p7, %s1912_s29, %s238_s14  }
   0xd   : > { %p327_p10 = pnand %p1691_p6, %p326_p9 }
   0xe   : > { %p384_p11 = scmp.lt.s32.totalorder (!%p327_p10), %s1916_s30, 1  ;;  %v1926_v0 = vmov (!%p327_p10), 0.0   ;;  %vm1927_vm0 = vmmov (!%p327_p10), 0   ;;  %v420_v1 = vld [vmem:[%s2667_s2 + $0x10] sm:$0xff] (!%p327_p10)  ;;  %v1928_v2 = vmov (!%p327_p10), 0   ;;  %v1929_v3 = vmov (!%p327_p10), 1  }
   0xf   : > { %330 = sbr.rel (%p327_p10) target bundleno = 757 (0x2f5), region = 52  ;;  %1715 = vmatprep.subr.mxu1 (!%p327_p10), %v1926_v0  ;;  %1717 = vmatprep.mubr.msk.f32.mxu1 (!%p327_p10), %vm1927_vm0, %v1926_v0  ;;  %v2060_v4 = vld [vmem:[%s2669_s4 + $0x8] sm:$0xff] (!%p327_p10)  ;;  %vm449_vm1 = vcmask (!%p327_p10), 1043456   ;;  %v2066_v5 = vld [vmem:[%s2669_s4] sm:$0xff] (!%p327_p10)  ;;  %vm439_vm2 = vcmask (!%p327_p10), 31744   ;;  %v1930_v10 = vmov (!%p327_p10), 3   ;;  %v639_v47 = vlaneseq (!%p327_p10) }
  0x10   : > { %520 = vmatprep.mubr.f32.mxu0 (!%p327_p10), %v1926_v0  ;;  %1820 = vset.pattern.permute.xlu1 (!%p327_p10), %v1928_v2  ;;  %v413_v6 = vld [vmem:[%s2666_s1] sm:$0xff] (!%p327_p10)  ;;  %v414_v11 = vld [vmem:[%s2666_s1 + $0x8] sm:$0xff] (!%p327_p10)  ;;  %v1931_v12 = vmov (!%p327_p10), 2   ;;  %v415_v13 = vld [vmem:[%s2666_s1 + $0x10] sm:$0xff] (!%p327_p10)  ;;  %v1932_v14 = vmov (!%p327_p10), 4   ;;  %v1933_v15 = vmov (!%p327_p10), 5  }
  0x11   : > { %433 = vperm.xlu1 (!%p327_p10), %1820, %v420_v1   ;;  %1822 = vset.pattern.permute.xlu0 (!%p327_p10), %v1929_v3  ;;  %v675_v16 = vld [vmem:[%s2669_s4 + $0x10] sm:$0xff] (!%p327_p10)  ;;  %v1934_v17 = vmov (!%p327_p10), 6   ;;  %v1935_v18 = vmov (!%p327_p10), 8   ;;  %v1936_v19 = vmov (!%p327_p10), 7   ;;  %v418_v20 = vld [vmem:[%s2667_s2] sm:$0xff] (!%p327_p10)  ;;  %v419_v21 = vld [vmem:[%s2667_s2 + $0x8] sm:$0xff] (!%p327_p10) }
  0x12   : > { %714 = vperm.xlu0 (!%p327_p10), %1822, %v2060_v4   ;;  %v1294_v22 = vld [vmem:[%s2670_s5 + $0x8] sm:$0xff] (!%p327_p10)  ;;  %v1295_v23 = vld [vmem:[%s2670_s5 + $0x10] sm:$0xff] (!%p327_p10)  ;;  %v1293_v24 = vld [vmem:[%s2670_s5] sm:$0xff] (!%p327_p10)  ;;  %v640_v49 = vshrl.u32 (!%p327_p10), %v639_v47, 7  ;;  %vm665_vm3 = vcmask (!%p327_p10), 556032   ;;  %s1937_s26 = smov (!%p327_p10), 108  }
  0x13   : > { %v637_v54 = vld [vmem:[%s2668_s3] sm:$0x7] (!%p327_p10)  ;;  %s1938_s11 = smov (!%p327_p10), 127   ;;  %s1939_s12 = smov (!%p327_p10), 91   ;;  %vm757_vm4 = vcmask (!%p327_p10), 1039360   ;;  %vm830_vm5 = vcmask (!%p327_p10), 1031168  }
  0x14   : > { %v649_v52 = vsub.s32 (!%p327_p10), 2, %v640_v49  ;;  %v641_v58 = vsub.s32 (!%p327_p10), 0, %v640_v49  ;;  %v645_v62 = vsub.s32 (!%p327_p10), 1, %v640_v49  ;;  %s1941_s16 = smov (!%p327_p10), 110   ;;  %s1942_s19 = smov (!%p327_p10), 109   ;;  %vm903_vm6 = vcmask (!%p327_p10), 900096  }
  0x15   : > { %1821 = vset.pattern.permute.xlu1 (!%p327_p10), %v1929_v3  ;;  %s1943_s20 = smov (!%p327_p10), 92   ;;  %vm976_vm7 = vcmask (!%p327_p10), 891904   ;;  %vm1049_vm8 = vcmask (!%p327_p10), 883712   ;;  %vm1122_vm9 = vcmask (!%p327_p10), 752640   ;;  %vm1195_vm10 = vcmask (!%p327_p10), 744448   ;;  %s1946_s23 = smov (!%p327_p10), [#allocation4]  }
  0x16   : > { %s385_s21 = scalar_select %p384_p11, %s1916_s30, 1  ;;  %710 = vperm.xlu1 %1821, %v2066_v5   ;;  %1824 = vset.pattern.permute.xlu0 %v1930_v10  ;;  %v650_v60 = vrot.slane %v637_v54, %v649_v52  ;;  %vm1268_vm11 = vcmask 736256   ;;  %vm1339_vm12 = vcmask 195584   ;;  %vm1490_vm13 = vcmask 261120  }
  0x17   : > { %856 = vperm.xlu0 %1824, %v2066_v5  }
  0x18   : > { %s1743_s24 = smul.u32 12, %s385_s21  ;;  %s1944_s21 = smov 90  }
  0x1a   : > { %s388_s14 = scalar_lea.vmem %s2665_s0, %s1743_s24  ;;  %1823 = vset.pattern.permute.xlu1 %v1931_v12  ;;  %s1850_s24 = sshll.u32 %s1946_s23, 4  ;;  %s1851_s24 = int_to_ptr.vmem [resolvable:$false] %s1850_s24 }
  0x1b   : > { %v417_v7 = vld [vmem:[%s388_s14 + $0x8] sm:$0xf]  ;;  %v416_v8 = vld [vmem:[%s388_s14] sm:$0xff]  ;;  %783 = vperm.xlu1 %1823, %v2066_v5   ;;  %1827 = vset.pattern.permute.xlu0 %v1932_v14  ;;  %s1940_s14 = smov 126   ;;  %s1852_s25 = scalar_lea.vmem %s1851_s24, 768 }
  0x1c   : > { %1716 = vmatpush3.msk.msra.mxu1 %vm449_vm1, %v417_v7  ;;  %v438_v9 = vcombine.high %v416_v8, %v416_v8  ;;  %929 = vperm.xlu0 %1827, %v2066_v5  }
  0x1d   : > { %1718 = vmatmul.mubr.msk.f32.vlgmr.msra.gmra.mrb[0].mxu1 %vm439_vm2, %v413_v6 }
  0x1e   : > { %1693 = vmatprep.subr.msk.mxu0 %vm449_vm1, %v438_v9  ;;  %1720 = vmatprep.mubr.msk.f32.mxu1 %vm1927_vm0, %v1926_v0  ;;  %v642_v9 = vrot.slane %v637_v54, %v641_v58 }
  0x1f   : > { %1694 = vmatpush1.msk.msra.mxu0 %vm449_vm1, %v416_v8  ;;  %787 = vperm.xlu1 %1823, %v2060_v4  }
  0x20   : > { %1695 = vmatmul.mubr.msk.f32.vlgmr.msra.gmra.mrb[0].mxu0 %vm439_vm2, %v413_v6  ;;  %1830 = vset.pattern.permute.xlu0 %v1933_v15 }
  0x21   : > { %1721 = vmatmul.mubr.msk.f32.gmra.mrb[2].mxu1 %vm439_vm2, %v414_v11  ;;  %526 = vmatprep.mubr.f32.mxu0 %v1926_v0 }
  0x22   : > { %1723 = vmatprep.mubr.msk.f32.mxu1 %vm1927_vm0, %v1926_v0  ;;  %1002 = vperm.xlu0 %1830, %v2066_v5  }
  0x23   : > { %1825 = vset.pattern.permute.xlu1 %v1930_v10 }
  0x24   : > { %1696 = vmatmul.mubr.msk.f32.gmra.mrb[2].mxu0 %vm439_vm2, %v414_v11  ;;  %860 = vperm.xlu1 %1825, %v2060_v4  }
  0x25   : > { %1724 = vmatmul.mubr.msk.f32.gmra.mrb[4].mxu1 %vm439_vm2, %v415_v13  ;;  %532 = vmatprep.mubr.f32.mxu0 %v1926_v0 }
  0x26   : > { %1732 = vmatprep.mubr.msk.f32.mxu1 %vm1927_vm0, %v1926_v0  ;;  %1833 = vset.pattern.permute.xlu0 %v1934_v17 }
  0x27   : > { %1075 = vperm.xlu0 %1833, %v2066_v5  }
  0x28   : > { %1697 = vmatmul.mubr.msk.f32.gmra.mrb[4].mxu0 %vm439_vm2, %v415_v13  ;;  %1826 = vset.pattern.permute.xlu1 %v1929_v3 }
  0x29   : > { %1407 = vmatprep.mubr.f32.mxu0 %v1926_v0  ;;  %718 = vperm.xlu1 %1826, %v675_v16  }
  0x2b   : > { %1838 = vset.pattern.permute.xlu0 %v1935_v18 }
  0x2c   : > { %1221 = vperm.xlu0 %1838, %v2066_v5  }
  0x2d   : > { %1828 = vset.pattern.permute.xlu1 %v1932_v14 }
  0x2e   : > { %933 = vperm.xlu1 %1828, %v2060_v4  }
  0x30   : > { %1839 = vset.pattern.permute.xlu0 %v1936_v19 }
  0x31   : > { %1148 = vperm.xlu0 %1839, %v2066_v5  }
  0x32   : > { %1829 = vset.pattern.permute.xlu1 %v1931_v12  ;;  %v646_v12 = vrot.slane %v637_v54, %v645_v62 }
  0x33   : > { %791 = vperm.xlu1 %1829, %v675_v16  }
  0x35   : > { %1156 = vperm.xlu0 %1839, %v675_v16  }
  0x37   : > { %1831 = vset.pattern.permute.xlu1 %v1933_v15 }
  0x38   : > { %1006 = vperm.xlu1 %1831, %v2060_v4  }
  0x39   : > { %1842 = vset.pattern.permute.xlu0 %v1928_v2 }
  0x3a   : > { %423 = vperm.xlu0 %1842, %v418_v20  }
  0x3c   : > { %1832 = vset.pattern.permute.xlu1 %v1930_v10 }
  0x3d   : > { %864 = vperm.xlu1 %1832, %v675_v16  }
  0x3e   : > { %428 = vperm.xlu0 %1842, %v419_v21  }
  0x41   : > { %1834 = vset.pattern.permute.xlu1 %v1934_v17 }
  0x42   : > { %1079 = vperm.xlu1 %1834, %v2060_v4   ;;  %692 = vperm.xlu0 %1842, %v2060_v4  }
  0x46   : > { %1835 = vset.pattern.permute.xlu1 %v1932_v14  ;;  %1303 = vperm.xlu0 %1842, %v1294_v22  }
  0x47   : > { %937 = vperm.xlu1 %1835, %v675_v16  }
  0x4a   : > { %1308 = vperm.xlu0 %1842, %v1295_v23  }
  0x4b   : > { %1836 = vset.pattern.permute.xlu1 %v1936_v19 }
  0x4c   : > { %1152 = vperm.xlu1 %1836, %v2060_v4  }
  0x50   : > { %1837 = vset.pattern.permute.xlu1 %v1933_v15 }
  0x51   : > { %1010 = vperm.xlu1 %1837, %v675_v16  }
  0x55   : > { %1840 = vset.pattern.permute.xlu1 %v1935_v18 }
  0x56   : > { %1225 = vperm.xlu1 %1840, %v2060_v4  }
  0x5a   : > { %1841 = vset.pattern.permute.xlu1 %v1934_v17 }
  0x5b   : > { %1083 = vperm.xlu1 %1841, %v675_v16  }
  0x5f   : > { %1843 = vset.pattern.permute.xlu1 %v1935_v18 }
  0x60   : > { %1229 = vperm.xlu1 %1843, %v675_v16  }
  0x64   : > { %1844 = vset.pattern.permute.xlu1 %v1928_v2 }
  0x65   : > { %687 = vperm.xlu1 %1844, %v2066_v5  }
  0x69   : > { %697 = vperm.xlu1 %1844, %v675_v16  }
  0x6d   : > { %1298 = vperm.xlu1 %1844, %v1293_v24  }
  0x90   : > { %v2135_v25 = vpop.permute.xlu1 %433 }
  0x91   : > { %v2149_v32 = vpop.permute.xlu0 %714 }
  0x95   : > { %v2137_v26 = vpop.permute.xlu1 %710 }
  0x96   : > { %v2153_v34 = vpop.permute.xlu0 %856 }
  0x9a   : > { %v2139_v27 = vpop.permute.xlu1 %783 }
  0x9b   : > { %v2157_v36 = vpop.permute.xlu0 %929 }
  0x9e   : > { %v2141_v28 = vpop.permute.xlu1 %787 }
  0xa1   : > { %v2161_v38 = vpop.permute.xlu0 %1002 }
  0xa3   : > { %v2143_v29 = vpop.permute.xlu1 %860 }
  0xa6   : > { %v2165_v40 = vpop.permute.xlu0 %1075 }
  0xa8   : > { %v2145_v30 = vpop.permute.xlu1 %718 }
  0xab   : > { %v2169_v42 = vpop.permute.xlu0 %1221 }
  0xad   : > { %v2147_v31 = vpop.permute.xlu1 %933 }
  0xb0   : > { %v2173_v44 = vpop.permute.xlu0 %1148 }
  0xb2   : > { %v2151_v33 = vpop.permute.xlu1 %791 }
  0xb4   : > { %v2177_v46 = vpop.permute.xlu0 %1156 }
  0xb7   : > { %v2155_v35 = vpop.permute.xlu1 %1006 }
  0xb9   : > { %v424_v50 = vpop.permute.xlu0 %423 }
  0xbc   : > { %v2159_v37 = vpop.permute.xlu1 %864 }
  0xbd   : > { %v429_v57 = vpop.permute.xlu0 %428 }
  0xc1   : > { %v2163_v39 = vpop.permute.xlu1 %1079 }
  0xc6   : > { %v2167_v41 = vpop.permute.xlu1 %937 }
  0xcb   : > { %v2171_v43 = vpop.permute.xlu1 %1152 }
  0xd0   : > { %v2175_v45 = vpop.permute.xlu1 %1010 }
  0xd5   : > { %v2179_v48 = vpop.permute.xlu1 %1225 }
  0xda   : > { %v2181_v51 = vpop.permute.xlu1 %1083 }
  0xdf   : > { %v2186_v63 = vpop.permute.xlu1 %1229 }
  0xe4   : > { %v2190_v23 = vpop.permute.xlu1 %687 }
  0xf0   : > { %v605_v53 = vpop.f32.mrb[0].mxu1 }
  0xf1   : > { %v606_v55 = vadd.f32 %v605_v53, %v424_v50  ;;  %v1719_v56 = vpop.f32.mrb[1].mxu1 }
  0xf3   : > { %v621_v59 = vmax.f32 %v606_v55, 0.0  ;;  %v522_v61 = vpop.f32.mrb[0].mxu0 }
  0xf4   : > { %v523_v1 = vadd.f32 %v522_v61, %v424_v50  ;;  %v524_v2 = vpop.f32.mrb[1].mxu0  ;;  %v610_v3 = vpop.f32.mrb[2].mxu1 }
  0xf5   : > { %v630_v4 = vmin.f32 %v621_v59, 6.0  ;;  %v525_v5 = vadd.f32 %v524_v2, %v424_v50  ;;  %v611_v6 = vadd.f32 %v610_v3, %v429_v57  ;;  %v1722_v7 = vpop.f32.mrb[3].mxu1 }
  0xf6   : > { %v619_v8 = vmax.f32 %v523_v1, 0.0 }
  0xf7   : > { %v656_v10 = vmul.f32 %v650_v60, %v630_v4  ;;  %v620_v11 = vmax.f32 %v525_v5, 0.0  ;;  %v624_v13 = vmax.f32 %v611_v6, 0.0  ;;  %v528_v14 = vpop.f32.mrb[2].mxu0 }
  0xf8   : > { %v628_v15 = vmin.f32 %v619_v8, 6.0  ;;  %v529_v16 = vadd.f32 %v528_v14, %v429_v57  ;;  %v530_v17 = vpop.f32.mrb[3].mxu0  ;;  %v615_v18 = vpop.f32.mrb[4].mxu1 }
  0xf9   : > { %666 = vst.msk [vmem:[#allocation2 + $0x10] sm:$0xff] %vm665_vm3, %v656_v10  ;;  %v629_v19 = vmin.f32 %v620_v11, 6.0  ;;  %v633_v20 = vmin.f32 %v624_v13, 6.0  ;;  %v531_v21 = vadd.f32 %v530_v17, %v429_v57  ;;  %v616_v22 = vadd.f32 %v615_v18, %v2135_v25  ;;  %v1725_v24 = vpop.f32.mrb[5].mxu1  ;;  %v698_v14 = vpop.permute.xlu1 %697 }
  0xfa   : > { %v2192_v47 = vmul.f32 %v642_v9, %v628_v15  ;;  %v622_v49 = vmax.f32 %v529_v16, 0.0 }
  0xfb   : > { %v2194_v50 = vmul.f32 %v646_v12, %v629_v19  ;;  %v659_v52 = vmul.f32 %v650_v60, %v633_v20  ;;  %v623_v53 = vmax.f32 %v531_v21, 0.0  ;;  %v627_v54 = vmax.f32 %v616_v22, 0.0  ;;  %v534_v55 = vpop.f32.mrb[4].mxu0 }
  0xfc   : > { %v631_v56 = vmin.f32 %v622_v49, 6.0  ;;  %v535_v58 = vadd.f32 %v534_v55, %v2135_v25  ;;  %v536_v59 = vpop.f32.mrb[5].mxu0  ;;  %v2199_v57 = vmul.f32 %v2190_v23, %v2192_v47  ;;  %v721_v21 = vmul.f32 %v2137_v26, %v2192_v47 }
  0xfd   : > { %669 = vst.msk [vmem:[#allocation2 + $0x28] sm:$0xff] %vm665_vm3, %v659_v52  ;;  %v632_v61 = vmin.f32 %v623_v53, 6.0  ;;  %v636_v62 = vmin.f32 %v627_v54, 6.0  ;;  %v537_v1 = vadd.f32 %v536_v59, %v2135_v25  ;;  %v2205_v2 = vmul.f32 %v2190_v23, %v2194_v50 }
  0xfe   : > { %v2207_v3 = vmul.f32 %v642_v9, %v631_v56  ;;  %v625_v4 = vmax.f32 %v535_v58, 0.0  ;;  %v794_v24 = vmul.f32 %v2139_v27, %v2192_v47  ;;  %v867_v53 = vmul.f32 %v2153_v34, %v2192_v47 }
  0xff   : > { %v2209_v5 = vmul.f32 %v646_v12, %v632_v61  ;;  %v662_v6 = vmul.f32 %v650_v60, %v636_v62  ;;  %v626_v7 = vmax.f32 %v537_v1, 0.0  ;;  %v1013_v58 = vmul.f32 %v2161_v38, %v2192_v47 }
 0x100   : > { %v634_v8 = vmin.f32 %v625_v4, 6.0  ;;  %v2211_v10 = vld [vmem:[#allocation2 + $0x10] sm:$0xff]  ;;  %v940_v59 = vmul.f32 %v2157_v36, %v2192_v47  ;;  %v1159_v61 = vmul.f32 %v2173_v44, %v2192_v47  ;;  %v1086_v62 = vmul.f32 %v2165_v40, %v2192_v47 }
 0x101   : > { %672 = vst.msk [vmem:[#allocation2 + $0x40] sm:$0xff] %vm665_vm3, %v662_v6  ;;  %v635_v11 = vmin.f32 %v626_v7, 6.0  ;;  %v1015_v25 = vmul.f32 %v2161_v38, %v2211_v10  ;;  %v723_v13 = vmul.f32 %v2137_v26, %v2211_v10  ;;  %v1161_v17 = vmul.f32 %v2173_v44, %v2211_v10 }
 0x102   : > { %v2218_v15 = vmul.f32 %v642_v9, %v634_v8  ;;  %v796_v18 = vmul.f32 %v2139_v27, %v2211_v10  ;;  %v869_v20 = vmul.f32 %v2153_v34, %v2211_v10  ;;  %v942_v22 = vmul.f32 %v2157_v36, %v2211_v10 }
 0x103   : > { %v2220_v16 = vmul.f32 %v646_v12, %v635_v11  ;;  %1035 = vrot.lane.b32.xlu1 %v1015_v25, %s1937_s26  ;;  %743 = vrot.lane.b32.xlu0 %v723_v13, %s1938_s11  ;;  %v1088_v52 = vmul.f32 %v2165_v40, %v2211_v10  ;;  %v1234_v56 = vmul.f32 %v2169_v42, %v2211_v10 }
 0x104   : > { %v2225_v60 = vmul.f32 %v698_v14, %v2218_v15  ;;  %v2255_v49 = vmul.f32 %v2167_v41, %v2218_v15  ;;  %v722_v1 = vmul.f32 %v2137_v26, %v2194_v50  ;;  %v1232_v4 = vmul.f32 %v2169_v42, %v2192_v47  ;;  %v2293_v7 = vld [vmem:[#allocation2 + $0x28] sm:$0xff] }
 0x105   : > { %v2232_v9 = vmul.f32 %v698_v14, %v2220_v16  ;;  %v2263_v54 = vmul.f32 %v2167_v41, %v2220_v16  ;;  %v2269_v55 = vmul.f32 %v2175_v45, %v2220_v16  ;;  %v795_v6 = vmul.f32 %v2139_v27, %v2194_v50 }
 0x106   : > { %v726_v8 = vmul.f32 %v2149_v32, %v2293_v7  ;;  %v868_v26 = vmul.f32 %v2153_v34, %v2194_v50  ;;  %v799_v47 = vmul.f32 %v2141_v28, %v2293_v7  ;;  %v941_v27 = vmul.f32 %v2157_v36, %v2194_v50 }
 0x107   : > { %1181 = vrot.lane.b32.xlu1 %v1161_v17, %s1939_s12  ;;  %816 = vrot.lane.b32.xlu0 %v796_v18, %s1940_s14  ;;  %v872_v11 = vmul.f32 %v2143_v29, %v2293_v7  ;;  %v1018_v34 = vmul.f32 %v2155_v35, %v2293_v7  ;;  %v945_v25 = vmul.f32 %v2147_v31, %v2293_v7 }
 0x108   : > { %v2236_v12 = vld [vmem:[#allocation2 + $0x40] sm:$0xff]  ;;  %v1087_v36 = vmul.f32 %v2165_v40, %v2194_v50  ;;  %v1014_v13 = vmul.f32 %v2161_v38, %v2194_v50  ;;  %v1091_v17 = vmul.f32 %v2163_v39, %v2293_v7  ;;  %v1233_v40 = vmul.f32 %v2169_v42, %v2194_v50 }
 0x109   : > { %v2239_v19 = vmul.f32 %v698_v14, %v2236_v12  ;;  %v1164_v14 = vmul.f32 %v2171_v43, %v2293_v7  ;;  %v1160_v38 = vmul.f32 %v2173_v44, %v2194_v50  ;;  %v943_v18 = vmul.f32 %v2147_v31, %v2207_v3 }
 0x10a   : > { %v1089_v42 = vmul.f32 %v2163_v39, %v2207_v3  ;;  %v724_v44 = vmul.f32 %v2149_v32, %v2207_v3  ;;  %v1235_v50 = vmul.f32 %v2179_v48, %v2207_v3 }
 0x10b   : > { %889 = vrot.lane.b32.xlu0 %v869_v20, %s1941_s16  ;;  %739 = vrot.lane.b32.xlu1 %v721_v21, %s1938_s11  ;;  %v1945_v20 = vmov 0.0|0.0   ;;  %v1237_v21 = vmul.f32 %v2179_v48, %v2293_v7 }
 0x10c   : > { %1739 = vmatprep.subr.bf16.mxu1 %v1945_v20 }
 0x10f   : > { %962 = vrot.lane.b32.xlu0 %v942_v22, %s1942_s19  ;;  %812 = vrot.lane.b32.xlu1 %v794_v24, %s1940_s14  ;;  %v797_v22 = vmul.f32 %v2141_v28, %v2207_v3  ;;  %v725_v24 = vmul.f32 %v2149_v32, %v2209_v5  ;;  %v871_v32 = vmul.f32 %v2143_v29, %v2209_v5 }
 0x113   : > { %1108 = vrot.lane.b32.xlu0 %v1088_v52, %s1943_s20  ;;  %885 = vrot.lane.b32.xlu1 %v867_v53, %s1941_s16  ;;  %v870_v52 = vmul.f32 %v2143_v29, %v2207_v3  ;;  %v798_v53 = vmul.f32 %v2141_v28, %v2209_v5  ;;  %v944_v28 = vmul.f32 %v2147_v31, %v2209_v5 }
 0x114   : > { %v802_v29 = vmul.f32 %v2151_v33, %v2236_v12  ;;  %v1090_v31 = vmul.f32 %v2163_v39, %v2209_v5  ;;  %v1236_v39 = vmul.f32 %v2179_v48, %v2209_v5  ;;  %v1167_v48 = vmul.f32 %v2177_v46, %v2236_v12 }
 0x117   : > { %1254 = vrot.lane.b32.xlu0 %v1234_v56, %s1944_s21  ;;  %1031 = vrot.lane.b32.xlu1 %v1013_v58, %s1937_s26  ;;  %v1016_v56 = vmul.f32 %v2155_v35, %v2207_v3  ;;  %v1162_v58 = vmul.f32 %v2171_v43, %v2207_v3 }
 0x11b   : > { %958 = vrot.lane.b32.xlu0 %v940_v59, %s1942_s19  ;;  %1177 = vrot.lane.b32.xlu1 %v1159_v61, %s1939_s12  ;;  %v729_v59 = vmul.f32 %v2145_v30, %v2236_v12  ;;  %v1017_v61 = vmul.f32 %v2155_v35, %v2209_v5  ;;  %v1163_v35 = vmul.f32 %v2171_v43, %v2209_v5 }
 0x11c   : > { %v800_v43 = vmul.f32 %v2151_v33, %v2218_v15 }
 0x11f   : > { %1104 = vrot.lane.b32.xlu0 %v1086_v62, %s1943_s20  ;;  %741 = vrot.lane.b32.xlu1 %v722_v1, %s1938_s11  ;;  %v875_v62 = vmul.f32 %v2159_v37, %v2236_v12  ;;  %v948_v1 = vmul.f32 %v2167_v41, %v2236_v12  ;;  %v1094_v41 = vmul.f32 %v2181_v51, %v2236_v12 }
 0x123   : > { %1250 = vrot.lane.b32.xlu0 %v1232_v4, %s1944_s21  ;;  %814 = vrot.lane.b32.xlu1 %v795_v6, %s1940_s14  ;;  %v2393_v4 = vpop.permute.xlu0 %692  ;;  %v1021_v6 = vmul.f32 %v2175_v45, %v2236_v12 }
 0x127   : > { %749 = vrot.lane.b32.xlu0 %v726_v8, %s1938_s11  ;;  %887 = vrot.lane.b32.xlu1 %v868_v26, %s1941_s16  ;;  %v2405_v8 = vpop.permute.xlu0 %1303 }
 0x12b   : > { %822 = vrot.lane.b32.xlu0 %v799_v47, %s1940_s14  ;;  %960 = vrot.lane.b32.xlu1 %v941_v27, %s1942_s19  ;;  %v2415_v26 = vpop.permute.xlu0 %1308  ;;  %v2417_v47 = vpop.permute.xlu1 %1298  ;;  %v727_v27 = vmul.f32 %v2145_v30, %v2218_v15 }
 0x12f   : > { %895 = vrot.lane.b32.xlu0 %v872_v11, %s1941_s16  ;;  %1041 = vrot.lane.b32.xlu1 %v1018_v34, %s1937_s26 }
 0x133   : > { %968 = vrot.lane.b32.xlu0 %v945_v25, %s1942_s19  ;;  %1106 = vrot.lane.b32.xlu1 %v1087_v36, %s1943_s20  ;;  %v1165_v25 = vmul.f32 %v2177_v46, %v2218_v15  ;;  %v873_v36 = vmul.f32 %v2159_v37, %v2218_v15 }
 0x137   : > { %1033 = vrot.lane.b32.xlu0 %v1014_v13, %s1937_s26  ;;  %1187 = vrot.lane.b32.xlu1 %v1164_v14, %s1939_s12 }
 0x13b   : > { %1114 = vrot.lane.b32.xlu0 %v1091_v17, %s1943_s20  ;;  %1252 = vrot.lane.b32.xlu1 %v1233_v40, %s1944_s21  ;;  %v1019_v17 = vmul.f32 %v2175_v45, %v2218_v15  ;;  %v728_v45 = vmul.f32 %v2145_v30, %v2220_v16  ;;  %v1240_v30 = vmul.f32 %v2186_v63, %v2236_v12 }
 0x13c   : > { %v1238_v12 = vmul.f32 %v2186_v63, %v2218_v15 }
 0x13f   : > { %1179 = vrot.lane.b32.xlu0 %v1160_v38, %s1939_s12  ;;  %964 = vrot.lane.b32.xlu1 %v943_v18, %s1942_s19  ;;  %v1092_v18 = vmul.f32 %v2181_v51, %v2218_v15 }
 0x143   : > { %1260 = vrot.lane.b32.xlu0 %v1237_v21, %s1944_s21  ;;  %1110 = vrot.lane.b32.xlu1 %v1089_v42, %s1943_s20 }
 0x147   : > { %745 = vrot.lane.b32.xlu0 %v724_v44, %s1938_s11  ;;  %1256 = vrot.lane.b32.xlu1 %v1235_v50, %s1944_s21  ;;  %v874_v50 = vmul.f32 %v2159_v37, %v2220_v16 }
 0x14b   : > { %818 = vrot.lane.b32.xlu0 %v797_v22, %s1940_s14  ;;  %747 = vrot.lane.b32.xlu1 %v725_v24, %s1938_s11 }
 0x14f   : > { %891 = vrot.lane.b32.xlu0 %v870_v52, %s1941_s16  ;;  %820 = vrot.lane.b32.xlu1 %v798_v53, %s1940_s14  ;;  %v1239_v52 = vmul.f32 %v2186_v63, %v2220_v16 }
 0x153   : > { %1037 = vrot.lane.b32.xlu0 %v1016_v56, %s1937_s26  ;;  %893 = vrot.lane.b32.xlu1 %v871_v32, %s1941_s16 }
 0x157   : > { %1183 = vrot.lane.b32.xlu0 %v1162_v58, %s1939_s12  ;;  %966 = vrot.lane.b32.xlu1 %v944_v28, %s1942_s19 }
 0x15b   : > { %755 = vrot.lane.b32.xlu0 %v729_v59, %s1938_s11  ;;  %828 = vrot.lane.b32.xlu1 %v802_v29, %s1940_s14 }
 0x15f   : > { %1039 = vrot.lane.b32.xlu0 %v1017_v61, %s1937_s26  ;;  %1112 = vrot.lane.b32.xlu1 %v1090_v31, %s1943_s20  ;;  %v702_v31 = vmul.f32 %v2190_v23, %v2211_v10 }
 0x163   : > { %901 = vrot.lane.b32.xlu0 %v875_v62, %s1941_s16  ;;  %974 = vrot.lane.b32.xlu1 %v948_v1, %s1942_s19 }
 0x167   : > { %1185 = vrot.lane.b32.xlu0 %v1163_v35, %s1939_s12  ;;  %1258 = vrot.lane.b32.xlu1 %v1236_v39, %s1944_s21 }
 0x16b   : > { %1047 = vrot.lane.b32.xlu0 %v1021_v6, %s1937_s26  ;;  %1120 = vrot.lane.b32.xlu1 %v1094_v41, %s1943_s20 }
 0x16f   : > { %824 = vrot.lane.b32.xlu0 %v800_v43, %s1940_s14  ;;  %1193 = vrot.lane.b32.xlu1 %v1167_v48, %s1939_s12 }
 0x173   : > { %970 = vrot.lane.b32.xlu0 %v2255_v49, %s1942_s19  ;;  %751 = vrot.lane.b32.xlu1 %v727_v27, %s1938_s11  ;;  %v801_v49 = vmul.f32 %v2151_v33, %v2220_v16  ;;  %v1093_v33 = vmul.f32 %v2181_v51, %v2220_v16 }
 0x175   : > { %v2424_v11 = vpop.permute.xlu1 %1035  ;;  %v744_v34 = vpop.permute.xlu0 %743 }
 0x177   : > { %1189 = vrot.lane.b32.xlu0 %v1165_v25, %s1939_s12  ;;  %897 = vrot.lane.b32.xlu1 %v873_v36, %s1941_s16 }
 0x179   : > { %v2432_v13 = vpop.permute.xlu1 %1181  ;;  %v817_v14 = vpop.permute.xlu0 %816 }
 0x17b   : > { %826 = vrot.lane.b32.xlu0 %v801_v49, %s1940_s14  ;;  %1043 = vrot.lane.b32.xlu1 %v1019_v17, %s1937_s26 }
 0x17d   : > { %v890_v40 = vpop.permute.xlu0 %889  ;;  %v740_v38 = vpop.permute.xlu1 %739 }
 0x17f   : > { %972 = vrot.lane.b32.xlu0 %v2263_v54, %s1942_s19  ;;  %1116 = vrot.lane.b32.xlu1 %v1092_v18, %s1943_s20  ;;  %v1166_v54 = vmul.f32 %v2177_v46, %v2220_v16  ;;  %v1512_v46 = vld [vmem:[%s2672_s7] sm:$0xff] }
 0x181   : > { %v963_v20 = vpop.permute.xlu0 %962  ;;  %v813_v21 = vpop.permute.xlu1 %812 }
 0x183   : > { %1118 = vrot.lane.b32.xlu0 %v1093_v33, %s1943_s20  ;;  %753 = vrot.lane.b32.xlu1 %v728_v45, %s1938_s11 }
 0x185   : > { %v2451_v42 = vpop.permute.xlu0 %1108  ;;  %v886_v44 = vpop.permute.xlu1 %885 }
 0x187   : > { %1191 = vrot.lane.b32.xlu0 %v1166_v54, %s1939_s12  ;;  %899 = vrot.lane.b32.xlu1 %v874_v50, %s1941_s16  ;;  %s1744_s12 = smul.u32 384, %s1916_s30 }
 0x189   : > { %v2461_v51 = vpop.permute.xlu0 %1254  ;;  %v1032_v22 = vpop.permute.xlu1 %1031 }
 0x18b   : > { %1266 = vrot.lane.b32.xlu0 %v1240_v30, %s1944_s21  ;;  %1045 = vrot.lane.b32.xlu1 %v2269_v55, %s1937_s26  ;;  %s381_s26 = sand.u32 1, %s1908_s28  }
 0x18c   : > { %s1742_s11 = smul.u32 24, %s381_s26  ;;  %s1526_s30 = scalar_lea.sflag [#allocation5], %s381_s26 }
 0x18d   : > { %v959_v37 = vpop.permute.xlu0 %958  ;;  %v2469_v24 = vpop.permute.xlu1 %1177 }
 0x18e   : > { %s383_s14 = scalar_lea.vmem [#allocation4], %s1742_s11 }
 0x18f   : > { %1515 = vperm.xlu0 %1842, %v1512_v46   ;;  %1264 = vrot.lane.b32.xlu1 %v1239_v52, %s1944_s21  ;;  %s1540_s16 = sshll.u32 %s383_s14, 4  ;;  %s2620_s16 = int_to_ptr.vmem [resolvable:$true] %s1540_s16 }
 0x190   : > { %s1846_s22 = scalar_lea.vmem %s2620_s16, 384  ;;  %p1853_p1 = scmp.lt.s32.totalorder %s2620_s16, %s1851_s24 }
 0x191   : > { %v1105_v53 = vpop.permute.xlu0 %1104  ;;  %v742_v56 = vpop.permute.xlu1 %741  ;;  %p1847_p12 = scmp.ne.s32.totalorder %s2620_s16, %s1846_s22  ;;  %p1854_p2 = scmp.lt.s32.totalorder %s1852_s25, %s1846_s22 }
 0x192   : > { %v758_v55 = vsel %vm757_vm4, %v740_v38, %v742_v56  ;;  %v759_v32 = vsel %vm757_vm4, %v742_v56, %v744_v34  ;;  %v705_v38 = vmul.f32 %v2393_v4, %v2293_v7 }
 0x193   : > { %v773_v58 = vadd.f32 %v758_v55, %v2199_v57  ;;  %v774_v28 = vadd.f32 %v759_v32, %v2205_v2  ;;  %1262 = vrot.lane.b32.xlu1 %v1238_v12, %s1944_s21  ;;  %v775_v2 = vadd.f32 %v744_v34, %v702_v31  ;;  %s2618_s21 = scalar_lea.hbm %s2673_s8, %s1744_s12  ;;  %p1848_p13 = pnand %p1847_p12, %p2032_p4 }
 0x194   : > { %p1855_p3 = por %p1854_p2, %p1853_p1 }
 0x195   : > { %v2481_v16 = vpop.permute.xlu0 %1250  ;;  %v815_v59 = vpop.permute.xlu1 %814  ;;  %v848_v41 = vadd.f32 %v817_v14, %v775_v2  ;;  %p1849_p0 = pneg %p1848_p13 }
 0x196   : > { %v831_v29 = vsel %vm830_vm5, %v813_v21, %v815_v59  ;;  %v832_v63 = vsel %vm830_vm5, %v815_v59, %v817_v14 }
 0x197   : > { %v846_v15 = vadd.f32 %v831_v29, %v773_v58  ;;  %v847_v61 = vadd.f32 %v832_v63, %v774_v28  ;;  %v921_v27 = vadd.f32 %v890_v40, %v848_v41  ;;  %p1856_p5 = pnand %p1855_p3, %p1849_p0 }
 0x199   : > { %v2487_v62 = vpop.permute.xlu0 %749  ;;  %v888_v57 = vpop.permute.xlu1 %887  ;;  %v994_v49 = vadd.f32 %v963_v20, %v921_v27 }
 0x19a   : > { %v904_v1 = vsel %vm903_vm6, %v886_v44, %v888_v57  ;;  %v905_v35 = vsel %vm903_vm6, %v888_v57, %v890_v40  ;;  %v778_v18 = vadd.f32 %v2487_v62, %v705_v38 }
 0x19b   : > { %v919_v39 = vadd.f32 %v904_v1, %v846_v15  ;;  %v920_v6 = vadd.f32 %v905_v35, %v847_v61  ;;  %v1067_v14 = vadd.f32 %v2424_v11, %v994_v49 }
 0x19d   : > { %v2491_v43 = vpop.permute.xlu0 %822  ;;  %v961_v48 = vpop.permute.xlu1 %960  ;;  %v1140_v45 = vadd.f32 %v2451_v42, %v1067_v14 }
 0x19e   : > { %v977_v25 = vsel %vm976_vm7, %v959_v37, %v961_v48  ;;  %v978_v23 = vsel %vm976_vm7, %v961_v48, %v963_v20  ;;  %v851_v33 = vadd.f32 %v2491_v43, %v778_v18 }
 0x19f   : > { %v992_v10 = vadd.f32 %v977_v25, %v919_v39  ;;  %v993_v36 = vadd.f32 %v978_v23, %v920_v6  ;;  %v1213_v52 = vadd.f32 %v2432_v13, %v1140_v45 }
 0x1a1   : > { %v2495_v34 = vpop.permute.xlu0 %895  ;;  %v2497_v17 = vpop.permute.xlu1 %1041 }
 0x1a2   : > { %v924_v20 = vadd.f32 %v2495_v34, %v851_v33 }
 0x1a5   : > { %v2503_v21 = vpop.permute.xlu0 %968  ;;  %v1107_v40 = vpop.permute.xlu1 %1106 }
 0x1a6   : > { %v997_v7 = vadd.f32 %v2503_v21, %v924_v20  ;;  %v1123_v12 = vsel %vm1122_vm9, %v1105_v53, %v1107_v40  ;;  %v1124_v56 = vsel %vm1122_vm9, %v1107_v40, %v2451_v42 }
 0x1a8   : > { %v1070_v59 = vadd.f32 %v2497_v17, %v997_v7  ;;  %v703_v7 = vmul.f32 %v2393_v4, %v2207_v3 }
 0x1a9   : > { %v1034_v44 = vpop.permute.xlu0 %1033  ;;  %v2508_v54 = vpop.permute.xlu1 %1187 }
 0x1aa   : > { %v1050_v50 = vsel %vm1049_vm8, %v1032_v22, %v1034_v44  ;;  %v1051_v30 = vsel %vm1049_vm8, %v1034_v44, %v2424_v11  ;;  %v1286_v22 = vadd.f32 %v2461_v51, %v1213_v52 }
 0x1ab   : > { %v1065_v46 = vadd.f32 %v1050_v50, %v992_v10  ;;  %v1066_v37 = vadd.f32 %v1051_v30, %v993_v36  ;;  %v704_v50 = vmul.f32 %v2393_v4, %v2209_v5 }
 0x1ac   : > { %v1313_v31 = vadd.f32 %v2417_v47, %v1286_v22 }
 0x1ad   : > { %v2518_v55 = vpop.permute.xlu0 %1114  ;;  %v1253_v32 = vpop.permute.xlu1 %1252  ;;  %v1138_v58 = vadd.f32 %v1123_v12, %v1065_v46  ;;  %v1139_v28 = vadd.f32 %v1124_v56, %v1066_v37 }
 0x1ae   : > { %v1143_v11 = vadd.f32 %v2518_v55, %v1070_v59  ;;  %v1269_v57 = vsel %vm1268_vm11, %v2481_v16, %v1253_v32  ;;  %v1270_v2 = vsel %vm1268_vm11, %v1253_v32, %v2461_v51 }
 0x1b0   : > { %v1216_v1 = vadd.f32 %v2508_v54, %v1143_v11 }
 0x1b1   : > { %v1180_v29 = vpop.permute.xlu0 %1179  ;;  %v965_v63 = vpop.permute.xlu1 %964 }
 0x1b2   : > { %v1196_v53 = vsel %vm1195_vm10, %v2469_v24, %v1180_v29  ;;  %v1197_v42 = vsel %vm1195_vm10, %v1180_v29, %v2432_v13  ;;  %v1322_v13 = vmax.f32 %v1313_v31, 0.0 }
 0x1b3   : > { %v1211_v15 = vadd.f32 %v1196_v53, %v1138_v58  ;;  %v1212_v61 = vadd.f32 %v1197_v42, %v1139_v28 }
 0x1b4   : > { %v1331_v10 = vmin.f32 %v1322_v13, 6.0 }
 0x1b5   : > { %v1284_v35 = vadd.f32 %v1269_v57, %v1211_v15  ;;  %v1285_v39 = vadd.f32 %v1270_v2, %v1212_v61  ;;  %v2533_v6 = vpop.permute.xlu0 %1260  ;;  %v1111_v24 = vpop.permute.xlu1 %1110 }
 0x1b6   : > { %v1289_v41 = vadd.f32 %v2533_v6, %v1216_v1 }
 0x1b7   : > { %v1311_v13 = vadd.f32 %v2417_v47, %v1284_v35 }
 0x1b8   : > { %v1316_v48 = vadd.f32 %v2405_v8, %v1289_v41 }
 0x1b9   : > { %v746_v27 = vpop.permute.xlu0 %745  ;;  %v1257_v25 = vpop.permute.xlu1 %1256 }
 0x1ba   : > { %v1325_v23 = vmax.f32 %v1316_v48, 0.0  ;;  %v1312_v48 = vadd.f32 %v2417_v47, %v1285_v39 }
 0x1bc   : > { %v1334_v16 = vmin.f32 %v1325_v23, 6.0 }
 0x1bd   : > { %v819_v36 = vpop.permute.xlu0 %818  ;;  %v748_v49 = vpop.permute.xlu1 %747 }
 0x1be   : > { %v1740_v51 = vpack.c.bf16 %v1334_v16, %v1331_v10  ;;  %v760_v20 = vsel %vm757_vm4, %v746_v27, %v748_v49  ;;  %v761_v44 = vsel %vm757_vm4, %v748_v49, %v2487_v62 }
 0x1bf   : > { %v776_v46 = vadd.f32 %v760_v20, %v703_v7  ;;  %v777_v37 = vadd.f32 %v761_v44, %v704_v50 }
 0x1c0   : > { %1741 = vmatpush3.bf16.msra.mxu1 %v1740_v51  ;;  %v1320_v51 = vmax.f32 %v1311_v13, 0.0 }
 0x1c1   : > { %v892_v38 = vpop.permute.xlu0 %891  ;;  %v821_v14 = vpop.permute.xlu1 %820  ;;  %1730 = vmatprep.subr.mxu1 %v1926_v0 }
 0x1c2   : > { %v833_v30 = vsel %vm830_vm5, %v819_v36, %v821_v14  ;;  %v834_v0 = vsel %vm830_vm5, %v821_v14, %v2491_v43  ;;  %v1321_v14 = vmax.f32 %v1312_v48, 0.0 }
 0x1c3   : > { %v849_v3 = vadd.f32 %v833_v30, %v776_v46  ;;  %v850_v32 = vadd.f32 %v834_v0, %v777_v37 }
 0x1c5   : > { %v1038_v18 = vpop.permute.xlu0 %1037  ;;  %v894_v40 = vpop.permute.xlu1 %893 }
 0x1c6   : > { %v906_v56 = vsel %vm903_vm6, %v892_v38, %v894_v40  ;;  %v907_v62 = vsel %vm903_vm6, %v894_v40, %v2495_v34  ;;  %v1329_v40 = vmin.f32 %v1320_v51, 6.0 }
 0x1c7   : > { %v922_v58 = vadd.f32 %v906_v56, %v849_v3  ;;  %v923_v43 = vadd.f32 %v907_v62, %v850_v32 }
 0x1c9   : > { %v1184_v33 = vpop.permute.xlu0 %1183  ;;  %v967_v45 = vpop.permute.xlu1 %966 }
 0x1ca   : > { %v979_v5 = vsel %vm976_vm7, %v965_v63, %v967_v45  ;;  %v980_v4 = vsel %vm976_vm7, %v967_v45, %v2503_v21  ;;  %v1330_v45 = vmin.f32 %v1321_v14, 6.0 }
 0x1cb   : > { %v995_v29 = vadd.f32 %v979_v5, %v922_v58  ;;  %v996_v53 = vadd.f32 %v980_v4, %v923_v43 }
 0x1cd   : > { %v2548_v52 = vpop.permute.xlu0 %755  ;;  %v2550_v12 = vpop.permute.xlu1 %828 }
 0x1ce   : > { %v781_v50 = vadd.f32 %v2548_v52, %v2239_v19 }
 0x1d0   : > { %v854_v0 = vadd.f32 %v2550_v12, %v781_v50 }
 0x1d1   : > { %v1040_v28 = vpop.permute.xlu0 %1039  ;;  %v1113_v59 = vpop.permute.xlu1 %1112 }
 0x1d2   : > { %v1052_v22 = vsel %vm1049_vm8, %v1038_v18, %v1040_v28  ;;  %v1053_v11 = vsel %vm1049_vm8, %v1040_v28, %v2497_v17  ;;  %v1125_v63 = vsel %vm1122_vm9, %v1111_v24, %v1113_v59  ;;  %v1126_v21 = vsel %vm1122_vm9, %v1113_v59, %v2518_v55 }
 0x1d3   : > { %v1068_v42 = vadd.f32 %v1052_v22, %v995_v29  ;;  %v1069_v34 = vadd.f32 %v1053_v11, %v996_v53 }
 0x1d5   : > { %v2561_v15 = vpop.permute.xlu0 %901  ;;  %v2563_v61 = vpop.permute.xlu1 %974  ;;  %v1141_v31 = vadd.f32 %v1125_v63, %v1068_v42  ;;  %v1142_v57 = vadd.f32 %v1126_v21, %v1069_v34 }
 0x1d6   : > { %v927_v56 = vadd.f32 %v2561_v15, %v854_v0 }
 0x1d8   : > { %v1000_v32 = vadd.f32 %v2563_v61, %v927_v56 }
 0x1d9   : > { %v1186_v2 = vpop.permute.xlu0 %1185  ;;  %v1259_v1 = vpop.permute.xlu1 %1258 }
 0x1da   : > { %v1198_v41 = vsel %vm1195_vm10, %v1184_v33, %v1186_v2  ;;  %v1199_v17 = vsel %vm1195_vm10, %v1186_v2, %v2508_v54  ;;  %v1271_v24 = vsel %vm1268_vm11, %v1257_v25, %v1259_v1  ;;  %v1272_v55 = vsel %vm1268_vm11, %v1259_v1, %v2533_v6 }
 0x1db   : > { %v1214_v27 = vadd.f32 %v1198_v41, %v1141_v31  ;;  %v1215_v23 = vadd.f32 %v1199_v17, %v1142_v57 }
 0x1dd   : > { %v1287_v10 = vadd.f32 %v1271_v24, %v1214_v27  ;;  %v1288_v16 = vadd.f32 %v1272_v55, %v1215_v23  ;;  %v1048_v36 = vpop.permute.xlu0 %1047  ;;  %v1121_v49 = vpop.permute.xlu1 %1120 }
 0x1de   : > { %v1073_v5 = vadd.f32 %v1048_v36, %v1000_v32 }
 0x1df   : > { %v1314_v38 = vadd.f32 %v2405_v8, %v1287_v10  ;;  %v1315_v54 = vadd.f32 %v2405_v8, %v1288_v16 }
 0x1e0   : > { %v1146_v22 = vadd.f32 %v1121_v49, %v1073_v5 }
 0x1e1   : > { %v1323_v35 = vmax.f32 %v1314_v38, 0.0  ;;  %v1324_v18 = vmax.f32 %v1315_v54, 0.0  ;;  %v825_v47 = vpop.permute.xlu0 %824  ;;  %v1194_v39 = vpop.permute.xlu1 %1193 }
 0x1e3   : > { %v1332_v33 = vmin.f32 %v1323_v35, 6.0  ;;  %v1333_v25 = vmin.f32 %v1324_v18, 6.0 }
 0x1e5   : > { %v971_v20 = vpop.permute.xlu0 %970  ;;  %v752_v6 = vpop.permute.xlu1 %751  ;;  %v1735_v44 = vpack.c.bf16 %v1333_v25, %v1330_v45  ;;  %v1737_v7 = vpack.c.bf16 %v1332_v33, %v1329_v40 }
 0x1e7   : > { %1736 = vmatprep.subr.bf16.mxu0 %v1735_v44 }
 0x1e8   : > { %1738 = vmatpush1.bf16.msra.mxu0 %v1737_v7 }
 0x1e9   : > { %v1190_v30 = vpop.permute.xlu0 %1189  ;;  %v898_v8 = vpop.permute.xlu1 %897 }
 0x1ed   : > { %v827_v46 = vpop.permute.xlu0 %826  ;;  %v1044_v37 = vpop.permute.xlu1 %1043 }
 0x1ee   : > { %v835_v11 = vsel %vm830_vm5, %v825_v47, %v827_v46  ;;  %v836_v29 = vsel %vm830_vm5, %v827_v46, %v2550_v12  ;;  %v1338_v47 = vld [vmem:[%s2671_s6] sm:$0xff] }
 0x1f1   : > { %v973_v62 = vpop.permute.xlu0 %972  ;;  %v1117_v3 = vpop.permute.xlu1 %1116 }
 0x1f2   : > { %v982_v2 = vsel %vm976_vm7, %v973_v62, %v2563_v61 }
 0x1f5   : > { %v1119_v4 = vpop.permute.xlu0 %1118  ;;  %v754_v58 = vpop.permute.xlu1 %753 }
 0x1f6   : > { %v762_v43 = vsel %vm757_vm4, %v752_v6, %v754_v58  ;;  %v763_v19 = vsel %vm757_vm4, %v754_v58, %v2548_v52  ;;  %v1128_v55 = vsel %vm1122_vm9, %v1119_v4, %v1121_v49 }
 0x1f7   : > { %v779_v28 = vadd.f32 %v762_v43, %v2225_v60  ;;  %v780_v59 = vadd.f32 %v763_v19, %v2232_v9  ;;  %v1219_v60 = vadd.f32 %v1194_v39, %v1146_v22  ;;  %v981_v9 = vsel %vm976_vm7, %v971_v20, %v973_v62 }
 0x1f9   : > { %v1192_v53 = vpop.permute.xlu0 %1191  ;;  %v852_v42 = vadd.f32 %v835_v11, %v779_v28  ;;  %v853_v34 = vadd.f32 %v836_v29, %v780_v59  ;;  %v900_v63 = vpop.permute.xlu1 %899 }
 0x1fa   : > { %v908_v21 = vsel %vm903_vm6, %v898_v8, %v900_v63  ;;  %v909_v31 = vsel %vm903_vm6, %v900_v63, %v2561_v15  ;;  %v1127_v15 = vsel %vm1122_vm9, %v1117_v3, %v1119_v4  ;;  %v1201_v38 = vsel %vm1195_vm10, %v1192_v53, %v1194_v39 }
 0x1fb   : > { %v925_v52 = vadd.f32 %v908_v21, %v852_v42  ;;  %v926_v57 = vadd.f32 %v909_v31, %v853_v34  ;;  %v1200_v35 = vsel %vm1195_vm10, %v1190_v30, %v1192_v53 }
 0x1fd   : > { %v1267_v1 = vpop.permute.xlu0 %1266  ;;  %v998_v41 = vadd.f32 %v981_v9, %v925_v52  ;;  %v999_v12 = vadd.f32 %v982_v2, %v926_v57  ;;  %v1046_v17 = vpop.permute.xlu1 %1045 }
 0x1fe   : > { %v1292_v13 = vadd.f32 %v1267_v1, %v1219_v60  ;;  %v1054_v48 = vsel %vm1049_vm8, %v1044_v37, %v1046_v17  ;;  %v1055_v27 = vsel %vm1049_vm8, %v1046_v17, %v1048_v36 }
 0x1ff   : > { %v1071_v23 = vadd.f32 %v1054_v48, %v998_v41  ;;  %v1072_v24 = vadd.f32 %v1055_v27, %v999_v12 }
 0x200   : > { %v1319_v10 = vadd.f32 %v2415_v26, %v1292_v13 }
 0x201   : > { %v1144_v16 = vadd.f32 %v1127_v15, %v1071_v23  ;;  %v1145_v51 = vadd.f32 %v1128_v55, %v1072_v24  ;;  %v1265_v61 = vpop.permute.xlu1 %1264 }
 0x202   : > { %v1328_v54 = vmax.f32 %v1319_v10, 0.0  ;;  %v1274_v36 = vsel %vm1268_vm11, %v1265_v61, %v1267_v1 }
 0x203   : > { %v1218_v14 = vadd.f32 %v1201_v38, %v1145_v51  ;;  %v1217_v40 = vadd.f32 %v1200_v35, %v1144_v16 }
 0x204   : > { %v1337_v18 = vmin.f32 %v1328_v54, 6.0 }
 0x205   : > { %v1291_v49 = vadd.f32 %v1274_v36, %v1218_v14  ;;  %v1263_v33 = vpop.permute.xlu1 %1262 }
 0x206   : > { %v1273_v25 = vsel %vm1268_vm11, %v1263_v33, %v1265_v61  ;;  %1731 = vmatpush3.msra.mxu1 %v1337_v18 }
 0x207   : > { %v1318_v39 = vadd.f32 %v2415_v26, %v1291_v49  ;;  %v1290_v45 = vadd.f32 %v1273_v25, %v1217_v40  ;;  %1733 = vmatmul.mubr.msk.f32.vlgmr.msra.gmra.mrb[6].mxu1 %vm1339_vm12, %v1338_v47 }
 0x209   : > { %v1317_v20 = vadd.f32 %v2415_v26, %v1290_v45  ;;  %v1327_v6 = vmax.f32 %v1318_v39, 0.0 }
 0x20b   : > { %v1326_v44 = vmax.f32 %v1317_v20, 0.0  ;;  %v1336_v7 = vmin.f32 %v1327_v6, 6.0 }
 0x20d   : > { %v1335_v50 = vmin.f32 %v1326_v44, 6.0  ;;  %1347 = vmatprep.subr.mxu0 %v1336_v7 }
 0x20e   : > { %v1516_v0 = vpop.permute.xlu0 %1515 }
 0x20f   : > { %1348 = vmatpush1.msra.mxu0 %v1335_v50 }
 0x210   : > { %1702 = vmatmul.mubr.msk.f32.vlgmr.msra.gmra.mrb[6].mxu0 %vm1339_vm12, %v1338_v47 }
 0x2da   : > { %v1480_v30 = vpop.f32.mrb[6].mxu1 }
 0x2db   : > { %1491 = vst.msk [vmem:[#allocation3 + $0x10] sm:$0xff] %vm1490_vm13, %v1480_v30  ;;  %v1734_v8 = vpop.f32.mrb[7].mxu1 }
 0x2e2   : > { %v1511_v46 = vld [vmem:[#allocation3 + $0x10] sm:$0xff] }
 0x2e3   : > { %v1520_v26 = vadd.f32 %v1516_v0, %v1511_v46  ;;  %v1409_v37 = vpop.f32.mrb[6].mxu0 }
 0x2e4   : > { %v1411_v56 = vpop.f32.mrb[7].mxu0  ;;  %v1518_v62 = vadd.f32 %v1516_v0, %v1409_v37 }
 0x2e5   : > { %1524 = vst.msk [vmem:[%s383_s14 + $0x10] sm:$0xff] %vm1490_vm13, %v1520_v26  ;;  %v1519_v3 = vadd.f32 %v1516_v0, %v1411_v56 }
 0x2e6   : > { %1521 = vst [vmem:[%s383_s14] sm:$0xff] %v1518_v62 }
 0x2e7   : > { %1522 = vst [vmem:[%s383_s14 + $0x8] sm:$0xff] %v1519_v3 }
 0x2e8   : > { %1859 = shalt.err (!%p1856_p5)
}
 0x2e9   : > { %s1860_s26 = scalar_lea.hbm %s2618_s21, 384  ;;  %s1864_s14 = scalar_lea.hbm %s2673_s8, 768 }
 0x2ea   : > { %p1861_p6 = scmp.ne.s32.totalorder %s2618_s21, %s1860_s26  ;;  %p1865_p10 = scmp.lt.u32.totalorder %s2618_s21, %s2673_s8 }
 0x2eb   : > { %p1866_p11 = scmp.lt.u32.totalorder %s1864_s14, %s1860_s26  ;;  %p1868_p13 = scmp.lt.u32.totalorder %s1860_s26, %s2618_s21 }
 0x2ec   : > { %p1862_p7 = pnand %p1861_p6, %p2032_p4 }
 0x2ed   : > { %p1867_p12 = por %p1866_p11, %p1865_p10 }
 0x2ee   : > { %p1863_p9 = pneg %p1862_p7 }
 0x2ef   : > { %p1869_p0 = por %p1868_p13, %p1867_p12 }
 0x2f1   : > { %p1870_p1 = pnand %p1869_p0, %p1863_p9 }
 0x2f3   : > { %1873 = shalt.err (!%p1870_p1)
}
 0x2f4   : > { %1745 = dma.vmem_to_hbm [thread:$0]  (%p2032_p4), %s2620_s16, 384, %s2618_s21, %s1526_s30  }
 0x2f5 PF: > { %p1751_p2 = scmp.ge.s32.totalorder %s1924_s10, 2  ;;  %s1552_s22 = sand.u32 1, %s1904_s27  }
 0x2f6   : > { %s1553_s23 = scalar_lea.sflag [#allocation5], %s1552_s22 }
 0x2f7   : > { %p1748_p3 = pnand %p1751_p2, %p2039_p8 }
 0x2f9   : > { %1899 = dma.done.wait (!%p1748_p3), %s1553_s23, 384  }
 0x2fa   : > { %1901 = vsyncadd (!%p1748_p3), %s1553_s23, 4294966912  ;;  %s21_s10 = sadd.s32 1, %s1924_s10   ;;  %s2676_s27 = smov %s1908_s28 }
 0x2fb   : > { %p18_p5 = scmp.ge.s32.totalorder %s21_s10, 4   ;;  %s2677_s28 = smov %s1912_s29 }
 0x2fc   : > { %s2678_s29 = smov %s2045_s18  ;;  %s2679_s30 = smov %s1920_s9 }
 0x2fd   : > { %s2680_s9 = smov %s2682_s13  ;;  %20 = sbr.rel (!%p18_p5) target bundleno = 4 (0x4), region = 114 }
 0x304   :  { %1558 = vsyncpa [#allocation5], 1 }
 0x305   :  { %1560 = vsyncpa [#allocation5 + $0x1], 1 }

</bundles_post_ra>
